<compile_context>
chip_gen: v7x
topology: tpu7x:2x2x1
jax: 0.10.0
libtpu: 0.0.40
codegen_flags: <defaults>
</compile_context>

<pallas_src>
import functools

import jax
import jax.numpy as jnp
from jax.experimental import pallas as pl
from jax.experimental.pallas import tpu as pltpu

# ---- small, module-consistent dimensions (analogs of 2304 / 1024 / 768) ----
HEAD_DIM = 64     # get_head_dim(cfg) analog
HID      = 128    # 1024-wide hidden analog
L_DIM    = 96     # RoBERTa 768 pooler width analog
NUM_EV   = 5
NUM_PAIR = NUM_EV - 1
NUM_CLS  = 5
NPAD     = 128    # lane-dense padded class dim (sliced back to 5 in the wrapper)
NEG      = -1e9   # pad-class bias -> exp() underflows to exactly 0 in the loss
VOCAB    = 50


# --------------------------- Pallas kernel ----------------------------------
def _evrel_kernel(frm_ref, pool_ref, oh_ref,
                  wv1, bv1, wv2, bv2,
                  wl1v, wl1p, bl1, wl2, bl2,
                  wc1a, wc1b, bc1, wc2p, bc2p,
                  logits_ref, loss_ref, *, tb, nse):
    f32 = jnp.float32
    bf16 = jnp.bfloat16
    rn = tb * nse            # rows per event inside this batch block
    r5 = NUM_EV * tb         # vis rows, event-major: row = e*tb + t

    # ---- vid_feat_encoder: Linear -> ReLU -> Linear on flat (5*TB, HEAD) rows
    frm = frm_ref[...].reshape(r5, HEAD_DIM)                                 # bf16
    v = jnp.dot(frm, wv1[...], preferred_element_type=f32) + bv1[...]
    v = jnp.maximum(v, 0.0)
    vis = jnp.dot(v.astype(bf16), wv2[...], preferred_element_type=f32) + bv2[...]

    # ---- vis_lang_encoder layer 1 with split weights (no lane concat):
    #      cat([vis, pool]) @ wl1 == vis @ wl1[:HID] + pool @ wl1[HID:]
    # vis contribution computed once per (event, batch) row, broadcast over nse.
    vis_c = jnp.dot(vis.astype(bf16), wl1v[...], preferred_element_type=f32)  # (5*TB, HID)
    pool = pool_ref[...].reshape(r5 * nse, L_DIM)                             # bf16
    pool_c = jnp.dot(pool, wl1p[...], preferred_element_type=f32)             # (5*TB*nse, HID)
    x = pool_c.reshape(r5, nse, HID) + vis_c[:, None, :] + bl1[...]
    x = jnp.maximum(x, 0.0).reshape(r5 * nse, HID).astype(bf16)

    # ---- vis_lang_encoder layer 2
    vl = jnp.dot(x, wl2[...], preferred_element_type=f32) + bl2[...]
    vl = vl.astype(bf16)                                                      # (5*TB*nse, HID)

    # ---- event-pair selection [0,1,2,2] x [2,2,3,4] + classifier layer 1.
    # Rows are event-major, so index_select == contiguous row slices, and the
    # lane concat becomes: cat([vl1, vl2]) @ wc1 == vl1 @ wc1[:HID] + vl2 @ wc1[HID:]
    a = jnp.dot(vl[0 * rn:3 * rn], wc1a[...], preferred_element_type=f32)     # events 0,1,2
    b = jnp.dot(vl[2 * rn:5 * rn], wc1b[...], preferred_element_type=f32)     # events 2,3,4
    h = jnp.concatenate(
        [a[0 * rn:1 * rn] + b[0 * rn:1 * rn],    # pair (0, 2)
         a[1 * rn:2 * rn] + b[0 * rn:1 * rn],    # pair (1, 2)
         a[2 * rn:3 * rn] + b[1 * rn:2 * rn],    # pair (2, 3)
         a[2 * rn:3 * rn] + b[2 * rn:3 * rn]],   # pair (2, 4)
        axis=0)                                                               # (4*rn, HID)
    h = jnp.maximum(h + bc1[...], 0.0).astype(bf16)

    # ---- classifier layer 2, lane-dense padded output (NPAD = 128)
    logits = jnp.dot(h, wc2p[...], preferred_element_type=f32) + bc2p[...]    # (4*rn, NPAD)
    logits_ref[...] = logits.reshape(NUM_PAIR, rn, NPAD)

    # ---- cross-entropy partial sum for this batch block (mean taken outside).
    # Padded classes carry logit NEG, so exp(NEG - max) == 0 and they drop out.
    oh = oh_ref[...].reshape(NUM_PAIR * rn, NPAD).astype(f32)
    mx = jnp.max(logits, axis=-1, keepdims=True)
    lse = jnp.log(jnp.sum(jnp.exp(logits - mx), axis=-1, keepdims=True)) + mx
    picked = jnp.sum(logits * oh, axis=-1, keepdims=True)
    part = jnp.sum(lse - picked, axis=0, keepdims=True)                       # (1, 1)
    loss_ref[...] = part.reshape(1, 1, 1)


def _full_spec(arr):
    # Whole-array block with a constant index map: stays resident in VMEM and
    # is not re-copied when the grid advances (same block index every step).
    nd = arr.ndim
    return pl.BlockSpec(arr.shape, lambda i, _nd=nd: (0,) * _nd)


def _evrel_pallas(frm_em, pool_em, onehot_em, kp, *, nse, batch_block=None):
    B = frm_em.shape[1]
    tb = B if batch_block is None else batch_block
    assert B % tb == 0
    assert tb == B or (tb % 8 == 0 and (tb * nse) % 8 == 0), \
        "batch block must be the full batch or 8-aligned (incl. *nse)"
    nb = B // tb

    weight_keys = ('wv1', 'bv1', 'wv2', 'bv2',
                   'wl1v', 'wl1p', 'bl1', 'wl2', 'bl2',
                   'wc1a', 'wc1b', 'bc1', 'wc2p', 'bc2p')
    weights = [kp[k] for k in weight_keys]

    kernel = functools.partial(_evrel_kernel, tb=tb, nse=nse)

    grid_spec = pltpu.PrefetchScalarGridSpec(
        num_scalar_prefetch=0,
        grid=(nb,),
        in_specs=[
            pl.BlockSpec((NUM_EV, tb, HEAD_DIM), lambda i: (0, i, 0)),
            pl.BlockSpec((NUM_EV, tb * nse, L_DIM), lambda i: (0, i, 0)),
            pl.BlockSpec((NUM_PAIR, tb * nse, NPAD), lambda i: (0, i, 0)),
        ] + [_full_spec(w) for w in weights],
        out_specs=[
            pl.BlockSpec((NUM_PAIR, tb * nse, NPAD), lambda i: (0, i, 0)),
            pl.BlockSpec((1, 1, 1), lambda i: (i, 0, 0)),   # per-block partial loss
        ],
    )

    logits_pad, loss_parts = pl.pallas_call(
        kernel,
        out_shape=(jax.ShapeDtypeStruct((NUM_PAIR, B * nse, NPAD), jnp.float32),
                   jax.ShapeDtypeStruct((nb, 1, 1), jnp.float32)),
        grid_spec=grid_spec,
        compiler_params=pltpu.CompilerParams(
            dimension_semantics=("parallel",)),   # no cross-step state -> megacore-safe
    )(frm_em, pool_em, onehot_em, *weights)
    return logits_pad, loss_parts


# ------------------------------ glue (plain JAX) -----------------------------
def _prep_kernel_params(params):
    bf16 = jnp.bfloat16
    f32 = jnp.float32
    wl1 = params['wl1']                          # (HID + L_DIM, HID)
    wc1 = params['wc1']                          # (2 * HID, HID)
    wc2p = jnp.zeros((HID, NPAD), f32).at[:, :NUM_CLS].set(params['wc2'])
    bc2p = jnp.full((1, NPAD), NEG, f32).at[:, :NUM_CLS].set(params['bc2'])
    return {
        'wv1': params['wv1'].astype(bf16), 'bv1': params['bv1'].astype(f32),
        'wv2': params['wv2'].astype(bf16), 'bv2': params['bv2'].astype(f32),
        'wl1v': wl1[:HID].astype(bf16), 'wl1p': wl1[HID:].astype(bf16),
        'bl1': params['bl1'].astype(f32),
        'wl2': params['wl2'].astype(bf16), 'bl2': params['bl2'].astype(f32),
        'wc1a': wc1[:HID].astype(bf16), 'wc1b': wc1[HID:].astype(bf16),
        'bc1': params['bc1'].astype(f32),
        'wc2p': wc2p.astype(bf16), 'bc2p': bc2p,
    }


def sfpret_evrel_forward(params, inp, *, batch_block=None):
    src_toks = inp['evrel_seq_out_ones']          # (B, 5, nse, T) int32
    src_attn = inp['evrel_seq_out_ones_lens']     # (B, 5, nse, T) int32 mask
    B, num_ev, nse, T = src_toks.shape
    assert num_ev == NUM_EV
    assert inp['frm_feats'].shape[1] == NUM_EV
    B = inp['vseg_idx'].shape[0]

    # TODO(synk): the full RoBERTa transformer encoder is not translated; stand-in
    # is token embedding + attention-masked mean pooling + pooler dense + tanh.
    tok = src_toks.reshape(B * num_ev * nse, T)
    attn = src_attn.reshape(B * num_ev * nse, T).astype(jnp.float32)
    emb = params['tok_emb'][tok]                                   # (N, T, L_DIM)
    denom = jnp.clip(jnp.sum(attn, axis=-1, keepdims=True), 1.0)
    pooled = jnp.sum(emb * attn[..., None], axis=1) / denom
    pooler_out = jnp.tanh(pooled @ params['pool_w'] + params['pool_b'])
    pooler_out_5 = pooler_out.reshape(B, NUM_EV, nse, L_DIM)

    # Event-major layouts so the kernel sees flat (rows, features) 2-D tiles.
    frm_em = jnp.transpose(inp['frm_feats'], (1, 0, 2)).astype(jnp.bfloat16)   # (5, B, HEAD)
    pool_em = jnp.transpose(pooler_out_5, (1, 0, 2, 3)).reshape(
        NUM_EV, B * nse, L_DIM).astype(jnp.bfloat16)                           # (5, B*nse, L)

    labels = inp['evrel_labs'].astype(jnp.int32)                               # (B, 4, nse)
    labels_em = jnp.transpose(labels, (1, 0, 2)).reshape(NUM_PAIR, B * nse)
    onehot_em = (labels_em[..., None] ==
                 jnp.arange(NPAD, dtype=jnp.int32)).astype(jnp.bfloat16)       # (4, B*nse, NPAD)

    logits_pad, loss_parts = _evrel_pallas(
        frm_em, pool_em, onehot_em, _prep_kernel_params(params),
        nse=nse, batch_block=batch_block)

    logits = jnp.transpose(
        logits_pad.reshape(NUM_PAIR, B, nse, NPAD), (1, 0, 2, 3))[..., :NUM_CLS]
    loss = jnp.sum(loss_parts) / float(B * NUM_PAIR * nse)
    return {'loss': loss, 'mdl_out': logits}


# ------------------------- reference (pure JAX) -------------------------------
def _ref_core(params, frm, pool5, labels):
    """Pure-JAX reference using the same bf16-operand / f32-accumulate policy."""
    bf16, f32 = jnp.bfloat16, jnp.float32
    B, _, nse, _ = pool5.shape

    def lin(x, w, b):
        return jnp.dot(x.astype(bf16), w.astype(bf16),
                       preferred_element_type=f32) + b

    vis = jnp.maximum(lin(frm, params['wv1'], params['bv1']), 0.0)
    vis = lin(vis, params['wv2'], params['bv2'])
    vis = jnp.broadcast_to(vis[:, :, None, :], (B, NUM_EV, nse, HID))
    cat = jnp.concatenate([vis, pool5], axis=-1)
    vl = jnp.maximum(lin(cat, params['wl1'], params['bl1']), 0.0)
    vl = lin(vl, params['wl2'], params['bl2'])
    vl1 = vl[:, jnp.array([0, 1, 2, 2])]
    vl2 = vl[:, jnp.array([2, 2, 3, 4])]
    vl3 = jnp.concatenate([vl1, vl2], axis=-1)
    h = jnp.maximum(lin(vl3, params['wc1'], params['bc1']), 0.0)
    logits = lin(h, params['wc2'], params['bc2'])
    flat = logits.reshape(-1, NUM_CLS)
    lse = jax.scipy.special.logsumexp(flat, axis=-1)
    picked = jnp.take_along_axis(flat, labels.reshape(-1, 1), axis=-1)[:, 0]
    return logits, jnp.mean(lse - picked)


# ---------------------------------- init -------------------------------------
def init_params(key):
    ks = jax.random.split(key, 8)

    def lin(k, fin, fout):
        kw, kb = jax.random.split(k)
        w = jax.random.normal(kw, (fin, fout), jnp.float32) / jnp.sqrt(float(fin))
        b = jax.random.normal(kb, (1, fout), jnp.float32) * 0.02
        return w, b

    p = {}
    p['tok_emb'] = jax.random.normal(ks[0], (VOCAB, L_DIM), jnp.float32) * 0.02
    p['pool_w'], p['pool_b'] = lin(ks[1], L_DIM, L_DIM)
    p['wv1'], p['bv1'] = lin(ks[2], HEAD_DIM, HID)       # vid_feat_encoder
    p['wv2'], p['bv2'] = lin(ks[3], HID, HID)
    p['wl1'], p['bl1'] = lin(ks[4], HID + L_DIM, HID)    # vis_lang_encoder
    p['wl2'], p['bl2'] = lin(ks[5], HID, HID)
    p['wc1'], p['bc1'] = lin(ks[6], 2 * HID, HID)        # vis_lang_classf
    p['wc2'], p['bc2'] = lin(ks[7], HID, NUM_CLS)
    return p


if __name__ == "__main__":
    B, nse, T = 16, 2, 8          # small, but exercises 2 batch blocks of 8
    key = jax.random.PRNGKey(0)
    kp, k1, k2, k3, k4 = jax.random.split(key, 5)

    params = init_params(kp)

    src_toks = jax.random.randint(k1, (B, NUM_EV, nse, T), 0, VOCAB, jnp.int32)
    src_attn = (jax.random.uniform(k2, (B, NUM_EV, nse, T)) > 0.2).astype(jnp.int32)
    src_attn = src_attn.at[..., 0].set(1)
    frm_feats = jax.random.normal(k3, (B, NUM_EV, HEAD_DIM), jnp.float32)
    evrel_labs = jax.random.randint(k4, (B, NUM_PAIR, nse), 0, NUM_CLS, jnp.int32)

    inp = {
        'evrel_seq_out_ones': src_toks,
        'evrel_seq_out_ones_lens': src_attn,
        'frm_feats': frm_feats,
        'vseg_idx': jnp.arange(B, dtype=jnp.int32),
        'evrel_labs': evrel_labs,
    }

    out = sfpret_evrel_forward(params, inp, batch_block=8)
    jax.block_until_ready(out)

    # correctness check vs. pure-JAX reference (same bf16 matmul policy)
    tok = src_toks.reshape(B * NUM_EV * nse, T)
    attn = src_attn.reshape(B * NUM_EV * nse, T).astype(jnp.float32)
    emb = params['tok_emb'][tok]
    pooled = jnp.sum(emb * attn[..., None], axis=1) / jnp.clip(
        jnp.sum(attn, axis=-1, keepdims=True), 1.0)
    pooler5 = jnp.tanh(pooled @ params['pool_w'] + params['pool_b']
                       ).reshape(B, NUM_EV, nse, L_DIM)
    ref_logits, ref_loss = _ref_core(params, frm_feats, pooler5, evrel_labs)

    assert out['mdl_out'].shape == (B, NUM_PAIR, nse, NUM_CLS)
    assert jnp.allclose(out['mdl_out'], ref_logits, rtol=2e-2, atol=2e-2)
    assert jnp.allclose(out['loss'], ref_loss, rtol=2e-2, atol=2e-2)

    print("KERNEL_OK")
</pallas_src>

<mosaic_0001>
module attributes {stable_mosaic.version = 11 : i64} {
  func.func @_evrel_kernel(%arg0: i32, %arg1: memref<5x8x64xbf16, #tpu.memory_space<vmem>>, %arg2: memref<5x16x96xbf16, #tpu.memory_space<vmem>>, %arg3: memref<4x16x128xbf16, #tpu.memory_space<vmem>>, %arg4: memref<64x128xbf16, #tpu.memory_space<vmem>>, %arg5: memref<1x128xf32, #tpu.memory_space<vmem>>, %arg6: memref<128x128xbf16, #tpu.memory_space<vmem>>, %arg7: memref<1x128xf32, #tpu.memory_space<vmem>>, %arg8: memref<128x128xbf16, #tpu.memory_space<vmem>>, %arg9: memref<96x128xbf16, #tpu.memory_space<vmem>>, %arg10: memref<1x128xf32, #tpu.memory_space<vmem>>, %arg11: memref<128x128xbf16, #tpu.memory_space<vmem>>, %arg12: memref<1x128xf32, #tpu.memory_space<vmem>>, %arg13: memref<128x128xbf16, #tpu.memory_space<vmem>>, %arg14: memref<128x128xbf16, #tpu.memory_space<vmem>>, %arg15: memref<1x128xf32, #tpu.memory_space<vmem>>, %arg16: memref<128x128xbf16, #tpu.memory_space<vmem>>, %arg17: memref<1x128xf32, #tpu.memory_space<vmem>>, %arg18: memref<4x16x128xf32, #tpu.memory_space<vmem>>, %arg19: memref<1x1x1xf32, #tpu.memory_space<vmem>>) attributes {dimension_semantics = [#tpu.dimension_semantics<parallel>], iteration_bounds = array<i64: 2>, scalar_prefetch = 0 : i64, scratch_operands = 0 : i64, tpu.core_type = #tpu.core_type<tc>, window_params = [{transform_indices = @transform_0, window_bounds = array<i64: 5, 8, 64>}, {transform_indices = @transform_1, window_bounds = array<i64: 5, 16, 96>}, {transform_indices = @transform_2, window_bounds = array<i64: 4, 16, 128>}, {pipeline_mode = #tpu.pipeline_mode<synchronous>, transform_indices = @transform_3, window_bounds = array<i64: 64, 128>}, {pipeline_mode = #tpu.pipeline_mode<synchronous>, transform_indices = @transform_4, window_bounds = array<i64: 1, 128>}, {pipeline_mode = #tpu.pipeline_mode<synchronous>, transform_indices = @transform_5, window_bounds = array<i64: 128, 128>}, {pipeline_mode = #tpu.pipeline_mode<synchronous>, transform_indices = @transform_6, window_bounds = array<i64: 1, 128>}, {pipeline_mode = #tpu.pipeline_mode<synchronous>, transform_indices = @transform_7, window_bounds = array<i64: 128, 128>}, {pipeline_mode = #tpu.pipeline_mode<synchronous>, transform_indices = @transform_8, window_bounds = array<i64: 96, 128>}, {pipeline_mode = #tpu.pipeline_mode<synchronous>, transform_indices = @transform_9, window_bounds = array<i64: 1, 128>}, {pipeline_mode = #tpu.pipeline_mode<synchronous>, transform_indices = @transform_10, window_bounds = array<i64: 128, 128>}, {pipeline_mode = #tpu.pipeline_mode<synchronous>, transform_indices = @transform_11, window_bounds = array<i64: 1, 128>}, {pipeline_mode = #tpu.pipeline_mode<synchronous>, transform_indices = @transform_12, window_bounds = array<i64: 128, 128>}, {pipeline_mode = #tpu.pipeline_mode<synchronous>, transform_indices = @transform_13, window_bounds = array<i64: 128, 128>}, {pipeline_mode = #tpu.pipeline_mode<synchronous>, transform_indices = @transform_14, window_bounds = array<i64: 1, 128>}, {pipeline_mode = #tpu.pipeline_mode<synchronous>, transform_indices = @transform_15, window_bounds = array<i64: 128, 128>}, {pipeline_mode = #tpu.pipeline_mode<synchronous>, transform_indices = @transform_16, window_bounds = array<i64: 1, 128>}, {transform_indices = @transform_17, window_bounds = array<i64: 4, 16, 128>}, {transform_indices = @transform_18, window_bounds = array<i64: 1, 1, 1>}]} {
    %c0 = arith.constant 0 : index
    %c0_0 = arith.constant 0 : index
    %c0_1 = arith.constant 0 : index
    %0 = vector.load %arg1[%c0, %c0_0, %c0_1] : memref<5x8x64xbf16, #tpu.memory_space<vmem>>, vector<5x8x64xbf16>
    %1 = vector.shape_cast %0 : vector<5x8x64xbf16> to vector<40x64xbf16>
    %c0_2 = arith.constant 0 : index
    %c0_3 = arith.constant 0 : index
    %2 = vector.load %arg4[%c0_2, %c0_3] : memref<64x128xbf16, #tpu.memory_space<vmem>>, vector<64x128xbf16>
    %cst = arith.constant dense<0.000000e+00> : vector<40x128xf32>
    %3 = tpu.matmul %1, %2, %cst {dimension_numbers = #tpu.dot_dimension_numbers<[1], [0], [0], [1], [0, 0, 1, 1], [], []>} : vector<40x64xbf16>, vector<64x128xbf16>, vector<40x128xf32> -> vector<40x128xf32>
    %c0_4 = arith.constant 0 : index
    %c0_5 = arith.constant 0 : index
    %4 = vector.load %arg5[%c0_4, %c0_5] : memref<1x128xf32, #tpu.memory_space<vmem>>, vector<1x128xf32>
    %5 = vector.broadcast %4 : vector<1x128xf32> to vector<40x128xf32>
    %6 = arith.addf %3, %5 : vector<40x128xf32>
    %cst_6 = arith.constant 0.000000e+00 : f32
    %7 = vector.broadcast %cst_6 : f32 to vector<40x128xf32>
    %8 = arith.maximumf %6, %7 : vector<40x128xf32>
    %9 = arith.truncf %8 : vector<40x128xf32> to vector<40x128xbf16>
    %c0_7 = arith.constant 0 : index
    %c0_8 = arith.constant 0 : index
    %10 = vector.load %arg6[%c0_7, %c0_8] : memref<128x128xbf16, #tpu.memory_space<vmem>>, vector<128x128xbf16>
    %cst_9 = arith.constant dense<0.000000e+00> : vector<40x128xf32>
    %11 = tpu.matmul %9, %10, %cst_9 {dimension_numbers = #tpu.dot_dimension_numbers<[1], [0], [0], [1], [0, 0, 1, 1], [], []>} : vector<40x128xbf16>, vector<128x128xbf16>, vector<40x128xf32> -> vector<40x128xf32>
    %c0_10 = arith.constant 0 : index
    %c0_11 = arith.constant 0 : index
    %12 = vector.load %arg7[%c0_10, %c0_11] : memref<1x128xf32, #tpu.memory_space<vmem>>, vector<1x128xf32>
    %13 = vector.broadcast %12 : vector<1x128xf32> to vector<40x128xf32>
    %14 = arith.addf %11, %13 : vector<40x128xf32>
    %15 = arith.truncf %14 : vector<40x128xf32> to vector<40x128xbf16>
    %c0_12 = arith.constant 0 : index
    %c0_13 = arith.constant 0 : index
    %16 = vector.load %arg8[%c0_12, %c0_13] : memref<128x128xbf16, #tpu.memory_space<vmem>>, vector<128x128xbf16>
    %cst_14 = arith.constant dense<0.000000e+00> : vector<40x128xf32>
    %17 = tpu.matmul %15, %16, %cst_14 {dimension_numbers = #tpu.dot_dimension_numbers<[1], [0], [0], [1], [0, 0, 1, 1], [], []>} : vector<40x128xbf16>, vector<128x128xbf16>, vector<40x128xf32> -> vector<40x128xf32>
    %c0_15 = arith.constant 0 : index
    %c0_16 = arith.constant 0 : index
    %c0_17 = arith.constant 0 : index
    %18 = vector.load %arg2[%c0_15, %c0_16, %c0_17] : memref<5x16x96xbf16, #tpu.memory_space<vmem>>, vector<5x16x96xbf16>
    %19 = vector.shape_cast %18 : vector<5x16x96xbf16> to vector<80x96xbf16>
    %c0_18 = arith.constant 0 : index
    %c0_19 = arith.constant 0 : index
    %20 = vector.load %arg9[%c0_18, %c0_19] : memref<96x128xbf16, #tpu.memory_space<vmem>>, vector<96x128xbf16>
    %cst_20 = arith.constant dense<0.000000e+00> : vector<80x128xf32>
    %21 = tpu.matmul %19, %20, %cst_20 {dimension_numbers = #tpu.dot_dimension_numbers<[1], [0], [0], [1], [0, 0, 1, 1], [], []>} : vector<80x96xbf16>, vector<96x128xbf16>, vector<80x128xf32> -> vector<80x128xf32>
    %22 = vector.shape_cast %21 : vector<80x128xf32> to vector<40x2x128xf32>
    %23 = vector.shape_cast %17 : vector<40x128xf32> to vector<40x1x128xf32>
    %24 = vector.broadcast %23 : vector<40x1x128xf32> to vector<40x2x128xf32>
    %25 = arith.addf %22, %24 : vector<40x2x128xf32>
    %c0_21 = arith.constant 0 : index
    %c0_22 = arith.constant 0 : index
    %26 = vector.load %arg10[%c0_21, %c0_22] : memref<1x128xf32, #tpu.memory_space<vmem>>, vector<1x128xf32>
    %27 = vector.shape_cast %26 : vector<1x128xf32> to vector<1x1x128xf32>
    %28 = vector.broadcast %27 : vector<1x1x128xf32> to vector<40x2x128xf32>
    %29 = arith.addf %25, %28 : vector<40x2x128xf32>
    %cst_23 = arith.constant 0.000000e+00 : f32
    %30 = vector.broadcast %cst_23 : f32 to vector<40x2x128xf32>
    %31 = arith.maximumf %29, %30 : vector<40x2x128xf32>
    %32 = vector.shape_cast %31 : vector<40x2x128xf32> to vector<80x128xf32>
    %33 = arith.truncf %32 : vector<80x128xf32> to vector<80x128xbf16>
    %c0_24 = arith.constant 0 : index
    %c0_25 = arith.constant 0 : index
    %34 = vector.load %arg11[%c0_24, %c0_25] : memref<128x128xbf16, #tpu.memory_space<vmem>>, vector<128x128xbf16>
    %cst_26 = arith.constant dense<0.000000e+00> : vector<80x128xf32>
    %35 = tpu.matmul %33, %34, %cst_26 {dimension_numbers = #tpu.dot_dimension_numbers<[1], [0], [0], [1], [0, 0, 1, 1], [], []>} : vector<80x128xbf16>, vector<128x128xbf16>, vector<80x128xf32> -> vector<80x128xf32>
    %c0_27 = arith.constant 0 : index
    %c0_28 = arith.constant 0 : index
    %36 = vector.load %arg12[%c0_27, %c0_28] : memref<1x128xf32, #tpu.memory_space<vmem>>, vector<1x128xf32>
    %37 = vector.broadcast %36 : vector<1x128xf32> to vector<80x128xf32>
    %38 = arith.addf %35, %37 : vector<80x128xf32>
    %39 = arith.truncf %38 : vector<80x128xf32> to vector<80x128xbf16>
    %40 = vector.extract_strided_slice %39 {offsets = [0, 0], sizes = [48, 128], strides = [1, 1]} : vector<80x128xbf16> to vector<48x128xbf16>
    %c0_29 = arith.constant 0 : index
    %c0_30 = arith.constant 0 : index
    %41 = vector.load %arg13[%c0_29, %c0_30] : memref<128x128xbf16, #tpu.memory_space<vmem>>, vector<128x128xbf16>
    %cst_31 = arith.constant dense<0.000000e+00> : vector<48x128xf32>
    %42 = tpu.matmul %40, %41, %cst_31 {dimension_numbers = #tpu.dot_dimension_numbers<[1], [0], [0], [1], [0, 0, 1, 1], [], []>} : vector<48x128xbf16>, vector<128x128xbf16>, vector<48x128xf32> -> vector<48x128xf32>
    %43 = vector.extract_strided_slice %39 {offsets = [32, 0], sizes = [48, 128], strides = [1, 1]} : vector<80x128xbf16> to vector<48x128xbf16>
    %c0_32 = arith.constant 0 : index
    %c0_33 = arith.constant 0 : index
    %44 = vector.load %arg14[%c0_32, %c0_33] : memref<128x128xbf16, #tpu.memory_space<vmem>>, vector<128x128xbf16>
    %cst_34 = arith.constant dense<0.000000e+00> : vector<48x128xf32>
    %45 = tpu.matmul %43, %44, %cst_34 {dimension_numbers = #tpu.dot_dimension_numbers<[1], [0], [0], [1], [0, 0, 1, 1], [], []>} : vector<48x128xbf16>, vector<128x128xbf16>, vector<48x128xf32> -> vector<48x128xf32>
    %46 = vector.extract_strided_slice %42 {offsets = [0, 0], sizes = [16, 128], strides = [1, 1]} : vector<48x128xf32> to vector<16x128xf32>
    %47 = vector.extract_strided_slice %45 {offsets = [0, 0], sizes = [16, 128], strides = [1, 1]} : vector<48x128xf32> to vector<16x128xf32>
    %48 = arith.addf %46, %47 : vector<16x128xf32>
    %49 = vector.extract_strided_slice %42 {offsets = [16, 0], sizes = [16, 128], strides = [1, 1]} : vector<48x128xf32> to vector<16x128xf32>
    %50 = vector.extract_strided_slice %45 {offsets = [0, 0], sizes = [16, 128], strides = [1, 1]} : vector<48x128xf32> to vector<16x128xf32>
    %51 = arith.addf %49, %50 : vector<16x128xf32>
    %52 = vector.extract_strided_slice %42 {offsets = [32, 0], sizes = [16, 128], strides = [1, 1]} : vector<48x128xf32> to vector<16x128xf32>
    %53 = vector.extract_strided_slice %45 {offsets = [16, 0], sizes = [16, 128], strides = [1, 1]} : vector<48x128xf32> to vector<16x128xf32>
    %54 = arith.addf %52, %53 : vector<16x128xf32>
    %55 = vector.extract_strided_slice %42 {offsets = [32, 0], sizes = [16, 128], strides = [1, 1]} : vector<48x128xf32> to vector<16x128xf32>
    %56 = vector.extract_strided_slice %45 {offsets = [32, 0], sizes = [16, 128], strides = [1, 1]} : vector<48x128xf32> to vector<16x128xf32>
    %57 = arith.addf %55, %56 : vector<16x128xf32>
    %58 = tpu.concatenate %48, %51, %54, %57 in 0 : vector<16x128xf32>, vector<16x128xf32>, vector<16x128xf32>, vector<16x128xf32> -> vector<64x128xf32>
    %c0_35 = arith.constant 0 : index
    %c0_36 = arith.constant 0 : index
    %59 = vector.load %arg15[%c0_35, %c0_36] : memref<1x128xf32, #tpu.memory_space<vmem>>, vector<1x128xf32>
    %60 = vector.broadcast %59 : vector<1x128xf32> to vector<64x128xf32>
    %61 = arith.addf %58, %60 : vector<64x128xf32>
    %cst_37 = arith.constant 0.000000e+00 : f32
    %62 = vector.broadcast %cst_37 : f32 to vector<64x128xf32>
    %63 = arith.maximumf %61, %62 : vector<64x128xf32>
    %64 = arith.truncf %63 : vector<64x128xf32> to vector<64x128xbf16>
    %c0_38 = arith.constant 0 : index
    %c0_39 = arith.constant 0 : index
    %65 = vector.load %arg16[%c0_38, %c0_39] : memref<128x128xbf16, #tpu.memory_space<vmem>>, vector<128x128xbf16>
    %cst_40 = arith.constant dense<0.000000e+00> : vector<64x128xf32>
    %66 = tpu.matmul %64, %65, %cst_40 {dimension_numbers = #tpu.dot_dimension_numbers<[1], [0], [0], [1], [0, 0, 1, 1], [], []>} : vector<64x128xbf16>, vector<128x128xbf16>, vector<64x128xf32> -> vector<64x128xf32>
    %c0_41 = arith.constant 0 : index
    %c0_42 = arith.constant 0 : index
    %67 = vector.load %arg17[%c0_41, %c0_42] : memref<1x128xf32, #tpu.memory_space<vmem>>, vector<1x128xf32>
    %68 = vector.broadcast %67 : vector<1x128xf32> to vector<64x128xf32>
    %69 = arith.addf %66, %68 : vector<64x128xf32>
    %70 = vector.shape_cast %69 : vector<64x128xf32> to vector<4x16x128xf32>
    %c0_43 = arith.constant 0 : index
    %c0_44 = arith.constant 0 : index
    %c0_45 = arith.constant 0 : index
    %71 = vector.load %arg18[%c0_43, %c0_44, %c0_45] : memref<4x16x128xf32, #tpu.memory_space<vmem>>, vector<4x16x128xf32>
    tpu.vector_store %arg18[%c0_43, %c0_44, %c0_45], %70 {strides = array<i32>} : memref<4x16x128xf32, #tpu.memory_space<vmem>>, vector<4x16x128xf32>,
    %c0_46 = arith.constant 0 : index
    %c0_47 = arith.constant 0 : index
    %c0_48 = arith.constant 0 : index
    %72 = vector.load %arg3[%c0_46, %c0_47, %c0_48] : memref<4x16x128xbf16, #tpu.memory_space<vmem>>, vector<4x16x128xbf16>
    %73 = vector.shape_cast %72 : vector<4x16x128xbf16> to vector<64x128xbf16>
    %74 = arith.extf %73 : vector<64x128xbf16> to vector<64x128xf32>
    %cst_49 = arith.constant dense<0xFF800000> : vector<64xf32>
    %75 = vector.multi_reduction <maximumf>, %69, %cst_49 [1] : vector<64x128xf32> to vector<64xf32>
    %76 = vector.shape_cast %75 : vector<64xf32> to vector<64x1xf32>
    %77 = vector.broadcast %76 : vector<64x1xf32> to vector<64x128xf32>
    %78 = arith.subf %69, %77 : vector<64x128xf32>
    %79 = math.exp %78 : vector<64x128xf32>
    %cst_50 = arith.constant dense<0.000000e+00> : vector<64xf32>
    %80 = vector.multi_reduction <add>, %79, %cst_50 [1] : vector<64x128xf32> to vector<64xf32>
    %81 = vector.shape_cast %80 : vector<64xf32> to vector<64x1xf32>
    %82 = math.log %81 : vector<64x1xf32>
    %83 = arith.addf %82, %76 : vector<64x1xf32>
    %84 = arith.mulf %69, %74 : vector<64x128xf32>
    %cst_51 = arith.constant dense<0.000000e+00> : vector<64xf32>
    %85 = vector.multi_reduction <add>, %84, %cst_51 [1] : vector<64x128xf32> to vector<64xf32>
    %86 = vector.shape_cast %85 : vector<64xf32> to vector<64x1xf32>
    %87 = arith.subf %83, %86 : vector<64x1xf32>
    %cst_52 = arith.constant dense<0.000000e+00> : vector<1xf32>
    %88 = vector.multi_reduction <add>, %87, %cst_52 [0] : vector<64x1xf32> to vector<1xf32>
    %89 = vector.shape_cast %88 : vector<1xf32> to vector<1x1xf32>
    %90 = vector.shape_cast %89 : vector<1x1xf32> to vector<1x1x1xf32>
    %c0_53 = arith.constant 0 : index
    %c0_54 = arith.constant 0 : index
    %c0_55 = arith.constant 0 : index
    %91 = vector.load %arg19[%c0_53, %c0_54, %c0_55] : memref<1x1x1xf32, #tpu.memory_space<vmem>>, vector<1x1x1xf32>
    tpu.vector_store %arg19[%c0_53, %c0_54, %c0_55], %90 {strides = array<i32>} : memref<1x1x1xf32, #tpu.memory_space<vmem>>, vector<1x1x1xf32>,
    return
  }
  func.func @transform_0(%arg0: i32) -> (i32, i32, i32) {
    %c0_i32 = arith.constant 0 : i32
    %c0_i32_0 = arith.constant 0 : i32
    %c0_i32_1 = arith.constant 0 : i32
    return %c0_i32, %arg0, %c0_i32_0 : i32, i32, i32
  }
  func.func @transform_1(%arg0: i32) -> (i32, i32, i32) {
    %c0_i32 = arith.constant 0 : i32
    %c0_i32_0 = arith.constant 0 : i32
    %c0_i32_1 = arith.constant 0 : i32
    return %c0_i32, %arg0, %c0_i32_0 : i32, i32, i32
  }
  func.func @transform_2(%arg0: i32) -> (i32, i32, i32) {
    %c0_i32 = arith.constant 0 : i32
    %c0_i32_0 = arith.constant 0 : i32
    %c0_i32_1 = arith.constant 0 : i32
    return %c0_i32, %arg0, %c0_i32_0 : i32, i32, i32
  }
  func.func @transform_3(%arg0: i32) -> (i32, i32) {
    %c0_i32 = arith.constant 0 : i32
    %c0_i32_0 = arith.constant 0 : i32
    %c0_i32_1 = arith.constant 0 : i32
    return %c0_i32, %c0_i32_0 : i32, i32
  }
  func.func @transform_4(%arg0: i32) -> (i32, i32) {
    %c0_i32 = arith.constant 0 : i32
    %c0_i32_0 = arith.constant 0 : i32
    %c0_i32_1 = arith.constant 0 : i32
    return %c0_i32, %c0_i32_0 : i32, i32
  }
  func.func @transform_5(%arg0: i32) -> (i32, i32) {
    %c0_i32 = arith.constant 0 : i32
    %c0_i32_0 = arith.constant 0 : i32
    %c0_i32_1 = arith.constant 0 : i32
    return %c0_i32, %c0_i32_0 : i32, i32
  }
  func.func @transform_6(%arg0: i32) -> (i32, i32) {
    %c0_i32 = arith.constant 0 : i32
    %c0_i32_0 = arith.constant 0 : i32
    %c0_i32_1 = arith.constant 0 : i32
    return %c0_i32, %c0_i32_0 : i32, i32
  }
  func.func @transform_7(%arg0: i32) -> (i32, i32) {
    %c0_i32 = arith.constant 0 : i32
    %c0_i32_0 = arith.constant 0 : i32
    %c0_i32_1 = arith.constant 0 : i32
    return %c0_i32, %c0_i32_0 : i32, i32
  }
  func.func @transform_8(%arg0: i32) -> (i32, i32) {
    %c0_i32 = arith.constant 0 : i32
    %c0_i32_0 = arith.constant 0 : i32
    %c0_i32_1 = arith.constant 0 : i32
    return %c0_i32, %c0_i32_0 : i32, i32
  }
  func.func @transform_9(%arg0: i32) -> (i32, i32) {
    %c0_i32 = arith.constant 0 : i32
    %c0_i32_0 = arith.constant 0 : i32
    %c0_i32_1 = arith.constant 0 : i32
    return %c0_i32, %c0_i32_0 : i32, i32
  }
  func.func @transform_10(%arg0: i32) -> (i32, i32) {
    %c0_i32 = arith.constant 0 : i32
    %c0_i32_0 = arith.constant 0 : i32
    %c0_i32_1 = arith.constant 0 : i32
    return %c0_i32, %c0_i32_0 : i32, i32
  }
  func.func @transform_11(%arg0: i32) -> (i32, i32) {
    %c0_i32 = arith.constant 0 : i32
    %c0_i32_0 = arith.constant 0 : i32
    %c0_i32_1 = arith.constant 0 : i32
    return %c0_i32, %c0_i32_0 : i32, i32
  }
  func.func @transform_12(%arg0: i32) -> (i32, i32) {
    %c0_i32 = arith.constant 0 : i32
    %c0_i32_0 = arith.constant 0 : i32
    %c0_i32_1 = arith.constant 0 : i32
    return %c0_i32, %c0_i32_0 : i32, i32
  }
  func.func @transform_13(%arg0: i32) -> (i32, i32) {
    %c0_i32 = arith.constant 0 : i32
    %c0_i32_0 = arith.constant 0 : i32
    %c0_i32_1 = arith.constant 0 : i32
    return %c0_i32, %c0_i32_0 : i32, i32
  }
  func.func @transform_14(%arg0: i32) -> (i32, i32) {
    %c0_i32 = arith.constant 0 : i32
    %c0_i32_0 = arith.constant 0 : i32
    %c0_i32_1 = arith.constant 0 : i32
    return %c0_i32, %c0_i32_0 : i32, i32
  }
  func.func @transform_15(%arg0: i32) -> (i32, i32) {
    %c0_i32 = arith.constant 0 : i32
    %c0_i32_0 = arith.constant 0 : i32
    %c0_i32_1 = arith.constant 0 : i32
    return %c0_i32, %c0_i32_0 : i32, i32
  }
  func.func @transform_16(%arg0: i32) -> (i32, i32) {
    %c0_i32 = arith.constant 0 : i32
    %c0_i32_0 = arith.constant 0 : i32
    %c0_i32_1 = arith.constant 0 : i32
    return %c0_i32, %c0_i32_0 : i32, i32
  }
  func.func @transform_17(%arg0: i32) -> (i32, i32, i32) {
    %c0_i32 = arith.constant 0 : i32
    %c0_i32_0 = arith.constant 0 : i32
    %c0_i32_1 = arith.constant 0 : i32
    return %c0_i32, %arg0, %c0_i32_0 : i32, i32, i32
  }
  func.func @transform_18(%arg0: i32) -> (i32, i32, i32) {
    %c0_i32 = arith.constant 0 : i32
    %c0_i32_0 = arith.constant 0 : i32
    %c0_i32_1 = arith.constant 0 : i32
    return %arg0, %c0_i32, %c0_i32_0 : i32, i32, i32
  }
}

</mosaic_0001>

<bundles_post_ra>
// kernel: tpu_custom_call.1
= control target key start
LH: loop header
LB: loop body
LE: loop exit
PB: predicated region body
PF: predicated region fallthrough
CT: control target
= control target key end

     0   :  { %s5696_s0 = inlined_call_operand.hbm [shape: bf16[5,16,64], index: 0, kind: input, shape index: {}]   ;;  %s5697_s1 = inlined_call_operand.hbm [shape: bf16[5,32,96], index: 1, kind: input, shape index: {}]   ;;  %s5698_s2 = inlined_call_operand.hbm [shape: bf16[4,32,128], index: 2, kind: input, shape index: {}]   ;;  %s5699_s3 = inlined_call_operand.hbm [shape: bf16[64,128], index: 3, kind: input, shape index: {}]   ;;  %s5700_s4 = inlined_call_operand.vmem [shape: f32[1,128], index: 4, kind: input, shape index: {}]   ;;  %s5701_s5 = inlined_call_operand.hbm [shape: bf16[128,128], index: 5, kind: input, shape index: {}]   ;;  %s5702_s6 = inlined_call_operand.vmem [shape: f32[1,128], index: 6, kind: input, shape index: {}]   ;;  %s5703_s7 = inlined_call_operand.hbm [shape: bf16[128,128], index: 7, kind: input, shape index: {}]   ;;  %s5704_s8 = inlined_call_operand.hbm [shape: bf16[96,128], index: 8, kind: input, shape index: {}]   ;;  %s5705_s9 = inlined_call_operand.vmem [shape: f32[1,128], index: 9, kind: input, shape index: {}]   ;;  %s5706_s10 = inlined_call_operand.hbm [shape: bf16[128,128], index: 10, kind: input, shape index: {}]   ;;  %s5707_s11 = inlined_call_operand.vmem [shape: f32[1,128], index: 11, kind: input, shape index: {}]   ;;  %s5708_s12 = inlined_call_operand.hbm [shape: bf16[128,128], index: 12, kind: input, shape index: {}]   ;;  %s5709_s13 = inlined_call_operand.hbm [shape: bf16[128,128], index: 13, kind: input, shape index: {}]   ;;  %s5710_s14 = inlined_call_operand.vmem [shape: f32[1,128], index: 14, kind: input, shape index: {}]   ;;  %s5711_s15 = inlined_call_operand.hbm [shape: bf16[128,128], index: 15, kind: input, shape index: {}]   ;;  %s5712_s16 = inlined_call_operand.vmem [shape: f32[1,128], index: 16, kind: input, shape index: {}]   ;;  %s5713_s17 = inlined_call_operand.hbm [shape: f32[4,32,128], index: 17, kind: output, shape index: {0}]   ;;  %s5714_s18 = inlined_call_operand.vmem [shape: f32[2,1,1], index: 18, kind: output, shape index: {1}]  }
   0x1   :  { %5729 = sst [smem:[#allocation41_spill]] %s5696_s0 }
   0x2   :  { %5730 = sst [smem:[#allocation42_spill]] %s5697_s1 }
   0x3   :  { %5731 = sst [smem:[#allocation43_spill]] %s5698_s2 }
   0x4   :  { %5732 = sst [smem:[#allocation44_spill]] %s5699_s3 }
   0x5   :  { %5733 = sst [smem:[#allocation45_spill]] %s5700_s4 }
   0x6   :  { %5734 = sst [smem:[#allocation46_spill]] %s5702_s6 }
   0x7   :  { %5735 = sst [smem:[#allocation47_spill]] %s5705_s9 }
   0x8   :  { %5736 = sst [smem:[#allocation48_spill]] %s5707_s11 }
   0x9   :  { %5737 = sst [smem:[#allocation49_spill]] %s5710_s14 }
   0xa   :  { %5738 = sst [smem:[#allocation50_spill]] %s5712_s16 }
   0xb   :  { %5739 = sst [smem:[#allocation51_spill]] %s5713_s17 }
   0xc   :  { %5740 = sst [smem:[#allocation52_spill]] %s5714_s18 }
   0xd   :  { %24 = vsyncpa [#allocation3], 0 }
   0xe   :  { %26 = vsyncpa [#allocation3 + $0x1], 0 }
   0xf   :  { %27 = vsyncpa [#allocation6], 0 }
  0x10   :  { %29 = vsyncpa [#allocation6 + $0x1], 0 }
  0x11   :  { %30 = vsyncpa [#allocation9], 0 }
  0x12   :  { %31 = vsyncpa [#allocation12], 0 }
  0x13   :  { %32 = vsyncpa [#allocation15], 0 }
  0x14   :  { %33 = vsyncpa [#allocation18], 0 }
  0x15   :  { %34 = vsyncpa [#allocation4], 0 }
  0x16   :  { %36 = vsyncpa [#allocation4 + $0x1], 0  ;;  %s4567_s27 = smov 0   ;;  %s4569_s28 = smov 0  }
  0x17   :  { %s4571_s29 = smov 0   ;;  %s4573_s30 = smov 0  }
  0x18 LB: > { %5741 = sst [smem:[#allocation36_spill]] %s4421_s27  ;;  %s4588_s0 = sadd.s32 4294967295, %s4433_s30   ;;  %s4433_s30 = sphi %s4573_s30, %s5787_s30   ;;  %s4429_s29 = sphi %s4571_s29, %s5791_s29   ;;  %s4425_s28 = sphi %s4569_s28, %s5790_s28   ;;  %s4421_s27 = sphi %s4567_s27, %s5789_s27  }
  0x19   : > { %s3397_s19 = sadd.s32 4294967294, %s4433_s30   ;;  %s4592_s1 = sadd.s32 1, %s4433_s30  }
  0x1a   : > { %5742 = sst [smem:[#allocation37_spill]] %s4592_s1  ;;  %s49_s20 = sadd.s32 1, %s4429_s29 }
  0x1b   : > { %s46_s21 = ssub.s32 %s4433_s30, %s4592_s1  ;;  %p56_p0 = scmp.ne.s32.totalorder %s4429_s29, %s4425_s28 }
  0x1c   : > { %p47_p1 = scmp.eq.s32.totalorder %s46_s21, 0  ;;  %p57_p2 = scmp.eq.s32.totalorder %s4433_s30, 0 }
  0x1d   : > { %p62_p3 = scmp.ne.s32.totalorder %s4425_s28, %s4421_s27  ;;  %p5722_p4 = scmp.eq.s32.totalorder %s4588_s0, 0 }
  0x1e   : > { %s4604_s22 = scalar_select %p47_p1, %s4429_s29, %s49_s20  }
  0x1f   : > { %p4606_p5 = por %p57_p2, %p56_p0  ;;  %p4612_p6 = por %p5722_p4, %p62_p3 }
  0x20   : > { %5743 = sst [smem:[#allocation38_spill]] %s4604_s22  ;;  %p432_p7 = scmp.eq.s32.totalorder %s4588_s0, 1 }
  0x21   : > { %s5744_s2 = scalar_select %p4606_p5, 1, 0 }
  0x22   : > { %s5745_s23 = scalar_select %p4612_p6, 1, 0 }
  0x23   : > { %p438_p8 = scmp.eq.s32.totalorder %s3397_s19, 1  ;;  %p3398_p9 = scmp.ge.s32.totalorder %s4433_s30, 1 }
  0x24   : > { %p471_p10 = scmp.lt.s32.totalorder %s4433_s30, 3  ;;  %p4619_p11 = por %p432_p7, %p56_p0 }
  0x25   : > { %p4623_p12 = por %p438_p8, %p62_p3  ;;  %s4435_s20 = smov [#allocation8]  }
  0x26   : > { %s5746_s24 = scalar_select %p4619_p11, 1, 0 }
  0x27   : > { %s5748_s25 = scalar_select %p4623_p12, 1, 0 }
  0x28   : > { %5747 = sst [smem:[#allocation39_spill]] %s5746_s24  ;;  %p4627_p13 = pnand %p3398_p9, %p471_p10 }
  0x29   : > { %5749 = sst [smem:[#allocation40_spill]] %s5748_s25  ;;  %s483_s21 = sshll.u32 %s4435_s20, 4  ;;  %s484_s21 = int_to_ptr.vmem [resolvable:$true] %s483_s21 }
  0x2a   : > { %s5750_s26 = scalar_select %p4627_p13, 1, 0 }
  0x2b   : > { %p3911_p1 = pneg %p4627_p13  ;;  %s4436_s22 = smov [#allocation11]  }
  0x2c   : > { %s515_s1 = sshll.u32 %s4436_s22, 4  ;;  %s5752_s3 = sld [smem:[#allocation44_spill]]  ;;  %s4639_s1 = int_to_ptr.vmem [resolvable:$true] %s515_s1 }
  0x2d   : > { %p4635_p2 = pnand %p3911_p1, %p5722_p4 }
  0x2f   : > { %p4649_p3 = pneg %p4635_p2 }
  0x32   : > { %s4123_s17 = scalar_lea.hbm %s5752_s3, 512 }
  0x33   : > { %p4124_p0 = scmp.ne.s32.totalorder %s5752_s3, %s4123_s17  ;;  %p4130_p9 = scmp.lt.u32.totalorder %s4123_s17, %s5752_s3 }
  0x35   : > { %p4126_p7 = pnand %p4649_p3, %p4124_p0 }
  0x37   : > { %p4127_p8 = pneg %p4126_p7 }
  0x39   : > { %p4132_p10 = pnand %p4130_p9, %p4127_p8 }
  0x3b   : > { %4135 = shalt.err (!%p4132_p10)
}
  0x3c   : > { %s4136_s27 = scalar_lea.vmem %s484_s21, 512  ;;  %p4144_p11 = scmp.lt.s32.totalorder %s484_s21, %s484_s21 }
  0x3d   : > { %p4137_p1 = scmp.ne.s32.totalorder %s484_s21, %s4136_s27  ;;  %p4145_p6 = scmp.lt.s32.totalorder %s4136_s27, %s4136_s27 }
  0x3f   : > { %p4139_p4 = pnand %p4137_p1, %p4649_p3  ;;  %p4146_p13 = por %p4145_p6, %p4144_p11 }
  0x41   : > { %p4140_p12 = pneg %p4139_p4 }
  0x43   : > { %p4147_p5 = pnand %p4146_p13, %p4140_p12 }
  0x45   : > { %4150 = shalt.err (!%p4147_p5)
}
  0x46   : > { %s4437_s18 = smov 64   ;;  %s4438_s24 = smov 4  }
  0x47   : > { %3914 = dma.hbm_to_vmem [thread:$0]  (!%p4635_p2), %s5752_s3, 512, %s484_s21, [#allocation9], %s4437_s18, %s4437_s18, %s4438_s24  }
  0x48   : > { %s4151_s14 = scalar_lea.hbm %s5703_s7, 1024 }
  0x49   : > { %p4152_p4 = scmp.ne.s32.totalorder %s5703_s7, %s4151_s14  ;;  %p4158_p11 = scmp.lt.u32.totalorder %s4151_s14, %s5703_s7 }
  0x4b   : > { %p4154_p5 = pnand %p4152_p4, %p4649_p3 }
  0x4d   : > { %p4155_p6 = pneg %p4154_p5 }
  0x4f   : > { %p4160_p12 = pnand %p4158_p11, %p4155_p6 }
  0x51   : > { %4163 = shalt.err (!%p4160_p12)
}
  0x52   : > { %s4164_s21 = scalar_lea.vmem %s4639_s1, 1024  ;;  %p4172_p8 = scmp.lt.s32.totalorder %s4639_s1, %s4639_s1 }
  0x53   : > { %p4165_p13 = scmp.ne.s32.totalorder %s4639_s1, %s4164_s21  ;;  %p4173_p9 = scmp.lt.s32.totalorder %s4164_s21, %s4164_s21 }
  0x55   : > { %p4167_p0 = pnand %p4165_p13, %p4649_p3  ;;  %p4174_p10 = por %p4173_p9, %p4172_p8 }
  0x57   : > { %p4168_p7 = pneg %p4167_p0 }
  0x59   : > { %p4175_p1 = pnand %p4174_p10, %p4168_p7 }
  0x5b   : > { %4178 = shalt.err (!%p4175_p1)
}
  0x5c   : > { %3920 = dma.hbm_to_vmem [thread:$0]  (!%p4635_p2), %s5703_s7, 1024, %s4639_s1, [#allocation12], %s4437_s18, %s4437_s18, %s4438_s24  }
  0x5d   : > { %s4439_s11 = smov [#allocation14]   ;;  %s4440_s16 = smov [#allocation17]  }
  0x5e   : > { %s544_s14 = sshll.u32 %s4439_s11, 4  ;;  %s573_s17 = sshll.u32 %s4440_s16, 4  ;;  %s545_s14 = int_to_ptr.vmem [resolvable:$true] %s544_s14  ;;  %s574_s17 = int_to_ptr.vmem [resolvable:$true] %s573_s17 }
  0x5f   : > { %s4179_s27 = scalar_lea.hbm %s5706_s10, 1024 }
  0x60   : > { %p4180_p4 = scmp.ne.s32.totalorder %s5706_s10, %s4179_s27  ;;  %p4186_p11 = scmp.lt.u32.totalorder %s4179_s27, %s5706_s10 }
  0x62   : > { %p4182_p5 = pnand %p4180_p4, %p4649_p3 }
  0x64   : > { %p4183_p6 = pneg %p4182_p5 }
  0x66   : > { %p4188_p12 = pnand %p4186_p11, %p4183_p6 }
  0x68   : > { %4191 = shalt.err (!%p4188_p12)
}
  0x69   : > { %s4192_s1 = scalar_lea.vmem %s545_s14, 1024  ;;  %p4200_p8 = scmp.lt.s32.totalorder %s545_s14, %s545_s14 }
  0x6a   : > { %p4193_p13 = scmp.ne.s32.totalorder %s545_s14, %s4192_s1  ;;  %p4201_p9 = scmp.lt.s32.totalorder %s4192_s1, %s4192_s1 }
  0x6c   : > { %p4195_p0 = pnand %p4193_p13, %p4649_p3  ;;  %p4202_p10 = por %p4201_p9, %p4200_p8 }
  0x6e   : > { %p4196_p7 = pneg %p4195_p0 }
  0x70   : > { %p4203_p1 = pnand %p4202_p10, %p4196_p7 }
  0x72   : > { %4206 = shalt.err (!%p4203_p1)
}
  0x73   : > { %3926 = dma.hbm_to_vmem [thread:$0]  (!%p4635_p2), %s5706_s10, 1024, %s545_s14, [#allocation15], %s4437_s18, %s4437_s18, %s4438_s24  }
  0x74   : > { %s4207_s16 = scalar_lea.hbm %s5709_s13, 1024 }
  0x75   : > { %p4208_p4 = scmp.ne.s32.totalorder %s5709_s13, %s4207_s16  ;;  %p4214_p11 = scmp.lt.u32.totalorder %s4207_s16, %s5709_s13 }
  0x77   : > { %p4210_p5 = pnand %p4208_p4, %p4649_p3 }
  0x79   : > { %p4211_p6 = pneg %p4210_p5 }
  0x7b   : > { %p4216_p12 = pnand %p4214_p11, %p4211_p6 }
  0x7d   : > { %4219 = shalt.err (!%p4216_p12)
}
  0x7e   : > { %s4220_s6 = scalar_lea.vmem %s574_s17, 1024  ;;  %p4228_p8 = scmp.lt.s32.totalorder %s574_s17, %s574_s17 }
  0x7f   : > { %p4221_p13 = scmp.ne.s32.totalorder %s574_s17, %s4220_s6  ;;  %p4229_p9 = scmp.lt.s32.totalorder %s4220_s6, %s4220_s6 }
  0x81   : > { %p4223_p0 = pnand %p4221_p13, %p4649_p3  ;;  %p4230_p10 = por %p4229_p9, %p4228_p8 }
  0x83   : > { %p4224_p7 = pneg %p4223_p0 }
  0x85   : > { %p4231_p1 = pnand %p4230_p10, %p4224_p7 }
  0x87   : > { %4234 = shalt.err (!%p4231_p1)
}
  0x88   : > { %3932 = dma.hbm_to_vmem [thread:$0]  (!%p4635_p2), %s5709_s13, 1024, %s574_s17, [#allocation18], %s4437_s18, %s4437_s18, %s4438_s24  }
  0x89   : > { %s4441_s3 = smov [#allocation10]   ;;  %s4442_s9 = smov [#allocation13]  }
  0x8a   : > { %s499_s4 = sshll.u32 %s4441_s3, 4  ;;  %s528_s11 = sshll.u32 %s4442_s9, 4  ;;  %s500_s4 = int_to_ptr.vmem [resolvable:$true] %s499_s4  ;;  %s529_s11 = int_to_ptr.vmem [resolvable:$true] %s528_s11 }
  0x8b   : > { %s4235_s22 = scalar_lea.hbm %s5701_s5, 1024 }
  0x8c   : > { %p4236_p4 = scmp.ne.s32.totalorder %s5701_s5, %s4235_s22  ;;  %p4242_p11 = scmp.lt.u32.totalorder %s4235_s22, %s5701_s5 }
  0x8e   : > { %p4238_p5 = pnand %p4236_p4, %p4649_p3 }
  0x90   : > { %p4239_p6 = pneg %p4238_p5 }
  0x92   : > { %p4244_p12 = pnand %p4242_p11, %p4239_p6 }
  0x94   : > { %4247 = shalt.err (!%p4244_p12)
}
  0x95   : > { %s4248_s17 = scalar_lea.vmem %s500_s4, 1024  ;;  %p4256_p8 = scmp.lt.s32.totalorder %s500_s4, %s500_s4 }
  0x96   : > { %p4249_p13 = scmp.ne.s32.totalorder %s500_s4, %s4248_s17  ;;  %p4257_p9 = scmp.lt.s32.totalorder %s4248_s17, %s4248_s17 }
  0x98   : > { %p4251_p0 = pnand %p4249_p13, %p4649_p3  ;;  %p4258_p10 = por %p4257_p9, %p4256_p8 }
  0x9a   : > { %p4252_p7 = pneg %p4251_p0 }
  0x9c   : > { %p4259_p1 = pnand %p4258_p10, %p4252_p7 }
  0x9e   : > { %4262 = shalt.err (!%p4259_p1)
}
  0x9f   : > { %3917 = dma.hbm_to_vmem [thread:$0]  (!%p4635_p2), %s5701_s5, 1024, %s500_s4, [#allocation9], %s4437_s18, %s4437_s18, %s4438_s24  }
  0xa0   : > { %s4263_s25 = scalar_lea.hbm %s5704_s8, 768 }
  0xa1   : > { %p4264_p4 = scmp.ne.s32.totalorder %s5704_s8, %s4263_s25  ;;  %p4270_p11 = scmp.lt.u32.totalorder %s4263_s25, %s5704_s8 }
  0xa3   : > { %p4266_p5 = pnand %p4264_p4, %p4649_p3 }
  0xa5   : > { %p4267_p6 = pneg %p4266_p5 }
  0xa7   : > { %p4272_p12 = pnand %p4270_p11, %p4267_p6 }
  0xa9   : > { %4275 = shalt.err (!%p4272_p12)
}
  0xaa   : > { %s4276_s14 = scalar_lea.vmem %s529_s11, 768  ;;  %p4284_p8 = scmp.lt.s32.totalorder %s529_s11, %s529_s11 }
  0xab   : > { %p4277_p13 = scmp.ne.s32.totalorder %s529_s11, %s4276_s14  ;;  %p4285_p9 = scmp.lt.s32.totalorder %s4276_s14, %s4276_s14 }
  0xad   : > { %p4279_p0 = pnand %p4277_p13, %p4649_p3  ;;  %p4286_p10 = por %p4285_p9, %p4284_p8 }
  0xaf   : > { %p4280_p7 = pneg %p4279_p0 }
  0xb1   : > { %p4287_p1 = pnand %p4286_p10, %p4280_p7 }
  0xb3   : > { %4290 = shalt.err (!%p4287_p1)
}
  0xb4   : > { %3923 = dma.hbm_to_vmem [thread:$0]  (!%p4635_p2), %s5704_s8, 768, %s529_s11, [#allocation12], %s4437_s18, %s4437_s18, %s4438_s24  }
  0xb5   : > { %s4443_s1 = smov [#allocation16]   ;;  %s4444_s9 = smov [#allocation19]  }
  0xb6   : > { %s560_s3 = sshll.u32 %s4443_s1, 4  ;;  %s589_s16 = sshll.u32 %s4444_s9, 4  ;;  %s561_s3 = int_to_ptr.vmem [resolvable:$true] %s560_s3  ;;  %s590_s16 = int_to_ptr.vmem [resolvable:$true] %s589_s16 }
  0xb7   : > { %s4291_s27 = scalar_lea.hbm %s5708_s12, 1024 }
  0xb8   : > { %p4292_p4 = scmp.ne.s32.totalorder %s5708_s12, %s4291_s27  ;;  %p4298_p11 = scmp.lt.u32.totalorder %s4291_s27, %s5708_s12 }
  0xba   : > { %p4294_p5 = pnand %p4292_p4, %p4649_p3 }
  0xbc   : > { %p4295_p6 = pneg %p4294_p5 }
  0xbe   : > { %p4300_p12 = pnand %p4298_p11, %p4295_p6 }
  0xc0   : > { %4303 = shalt.err (!%p4300_p12)
}
  0xc1   : > { %s4304_s11 = scalar_lea.vmem %s561_s3, 1024  ;;  %p4312_p8 = scmp.lt.s32.totalorder %s561_s3, %s561_s3 }
  0xc2   : > { %p4305_p13 = scmp.ne.s32.totalorder %s561_s3, %s4304_s11  ;;  %p4313_p9 = scmp.lt.s32.totalorder %s4304_s11, %s4304_s11 }
  0xc4   : > { %p4307_p0 = pnand %p4305_p13, %p4649_p3  ;;  %p4314_p10 = por %p4313_p9, %p4312_p8 }
  0xc6   : > { %p4308_p7 = pneg %p4307_p0 }
  0xc8   : > { %p4315_p1 = pnand %p4314_p10, %p4308_p7 }
  0xca   : > { %4318 = shalt.err (!%p4315_p1)
}
  0xcb   : > { %3929 = dma.hbm_to_vmem [thread:$0]  (!%p4635_p2), %s5708_s12, 1024, %s561_s3, [#allocation15], %s4437_s18, %s4437_s18, %s4438_s24  }
  0xcc   : > { %s4319_s22 = scalar_lea.hbm %s5711_s15, 1024 }
  0xcd   : > { %p4320_p4 = scmp.ne.s32.totalorder %s5711_s15, %s4319_s22  ;;  %p4326_p11 = scmp.lt.u32.totalorder %s4319_s22, %s5711_s15 }
  0xcf   : > { %p4322_p5 = pnand %p4320_p4, %p4649_p3 }
  0xd1   : > { %p4323_p6 = pneg %p4322_p5 }
  0xd3   : > { %p4328_p12 = pnand %p4326_p11, %p4323_p6 }
  0xd5   : > { %4331 = shalt.err (!%p4328_p12)
}
  0xd6   : > { %s4332_s4 = scalar_lea.vmem %s590_s16, 1024  ;;  %p4340_p8 = scmp.lt.s32.totalorder %s590_s16, %s590_s16 }
  0xd7   : > { %p4333_p13 = scmp.ne.s32.totalorder %s590_s16, %s4332_s4  ;;  %p4341_p9 = scmp.lt.s32.totalorder %s4332_s4, %s4332_s4 }
  0xd9   : > { %p4335_p0 = pnand %p4333_p13, %p4649_p3  ;;  %p4342_p10 = por %p4341_p9, %p4340_p8 }
  0xdb   : > { %p4336_p7 = pneg %p4335_p0 }
  0xdd   : > { %p4343_p1 = pnand %p4342_p10, %p4336_p7 }
  0xdf   : > { %4346 = shalt.err (!%p4343_p1)
}
  0xe0   : > { %3935 = dma.hbm_to_vmem [thread:$0]  (!%p4635_p2), %s5711_s15, 1024, %s590_s16, [#allocation18], %s4437_s18, %s4437_s18, %s4438_s24  }
  0xe1   : > { %p3407_p4 = scmp.ge.s32.totalorder %s4433_s30, 2 }
  0xe2   : > { %s4824_s20 = sand.u32 (!%p3407_p4), 1, %s4429_s29   ;;  %s3408_s19 = sshll.u32 (!%p3407_p4), %s4433_s30, 6 }
  0xe3   : > { %602 = sbr.rel (%p3407_p4) target bundleno = 284 (0x11c), region = 72  ;;  %s5754_s25 = sld [smem:[#allocation41_spill]] (!%p3407_p4) }
  0xe4   : > { %s3847_s17 = smul.u32 (!%p3407_p4), 20, %s4824_s20  ;;  %s607_s16 = scalar_lea.sflag (!%p3407_p4), [#allocation3], %s4824_s20 }
  0xe5   : > { %p5755_p3 = scmp.ne.s32.totalorder (!%p3407_p4), %s5744_s2, 0 }
  0xe6   : > { %s610_s18 = scalar_lea.vmem (!%p3407_p4), [#allocation2], %s3847_s17 }
  0xe7   : > { %s616_s24 = sshll.u32 (!%p3407_p4), %s610_s18, 4  ;;  %s4833_s24 = int_to_ptr.vmem [resolvable:$true] %s616_s24 }
  0xe9   : > { %s4831_s22 = scalar_lea.hbm (!%p3407_p4), %s5754_s25, %s3408_s19  ;;  %s4351_s14 = scalar_lea.hbm (!%p3407_p4), %s5754_s25, 640 }
  0xea   : > { %s4347_s27 = scalar_lea.hbm %s4831_s22, 320  ;;  %p4352_p11 = scmp.lt.u32.totalorder %s4831_s22, %s5754_s25 }
  0xeb   : > { %p4348_p2 = scmp.ne.s32.totalorder %s4831_s22, %s4347_s27  ;;  %p4353_p12 = scmp.lt.u32.totalorder %s4351_s14, %s4347_s27 }
  0xec   : > { %p4355_p0 = scmp.lt.u32.totalorder %s4347_s27, %s4831_s22 }
  0xed   : > { %p4349_p5 = pnand %p4348_p2, %p5755_p3  ;;  %p4354_p13 = por %p4353_p12, %p4352_p11 }
  0xef   : > { %p4350_p6 = pneg %p4349_p5  ;;  %p4356_p7 = por %p4355_p0, %p4354_p13 }
  0xf1   : > { %p4357_p8 = pnand %p4356_p7, %p4350_p6 }
  0xf3   : > { %4360 = shalt.err (!%p4357_p8)
}
  0xf4   : > { %s4361_s11 = scalar_lea.vmem %s4833_s24, 320  ;;  %s4445_s19 = smov [#allocation2]  }
  0xf5   : > { %p4362_p9 = scmp.ne.s32.totalorder %s4833_s24, %s4361_s11  ;;  %s4365_s17 = sshll.u32 %s4445_s19, 4  ;;  %s4366_s17 = int_to_ptr.vmem [resolvable:$false] %s4365_s17 }
  0xf6   : > { %s4367_s1 = scalar_lea.vmem %s4366_s17, 640  ;;  %p4368_p2 = scmp.lt.s32.totalorder %s4833_s24, %s4366_s17 }
  0xf7   : > { %p4363_p10 = pnand %p4362_p9, %p5755_p3  ;;  %p4369_p5 = scmp.lt.s32.totalorder %s4367_s1, %s4361_s11 }
  0xf9   : > { %p4364_p1 = pneg %p4363_p10  ;;  %p4370_p11 = por %p4369_p5, %p4368_p2 }
  0xfb   : > { %p4371_p12 = pnand %p4370_p11, %p4364_p1 }
  0xfd   : > { %4374 = shalt.err (!%p4371_p12)
}
  0xfe   : > { %s4446_s9 = smov 128   ;;  %s4447_s18 = smov 64  }
  0xff   : > { %s4448_s27 = smov 4  }
 0x100   : > { %3867 = dma.hbm_to_vmem [thread:$0]  (%p5755_p3), %s4831_s22, 320, %s4833_s24, %s607_s16, %s4446_s9, %s4447_s18, %s4448_s27  }
 0x101   : > { %s626_s21 = sand.u32 1, %s4433_s30   ;;  %s3848_s6 = smul.u32 40, %s4824_s20 }
 0x102   : > { %s3514_s14 = sshll.u32 %s4433_s30, 7  ;;  %s5756_s11 = sld [smem:[#allocation42_spill]] }
 0x103   : > { %s3868_s17 = scalar_select %p5755_p3, [#allocation0], [#allocation27] }
 0x104   : > { %s630_s22 = scalar_lea.vmem [#allocation5], %s3848_s6  ;;  %s4449_s1 = smov 256  }
 0x105   : > { %s649_s24 = sshll.u32 %s630_s22, 4  ;;  %s641_s16 = sld [smem:[%s3868_s17]]   ;;  %s650_s24 = int_to_ptr.vmem [resolvable:$true] %s649_s24 }
 0x106   : > { %3869 = sst [smem:[#allocation22]] (%p5755_p3), %s4449_s1  ;;  %s4450_s9 = smov 128  }
 0x107   : > { %3870 = sst [smem:[#allocation22 + $0x1]] (%p5755_p3), %s4450_s9  ;;  %s4451_s18 = smov 2  }
 0x108   : > { %s636_s19 = scalar_lea.hbm %s5756_s11, %s3514_s14  ;;  %3871 = sst [smem:[#allocation22 + $0x2]] (%p5755_p3), %s4451_s18 }
 0x109   : > { %s4452_s27 = smov 64   ;;  %s4453_s6 = smov 4  }
 0x10a   : > { %3872 = sst [smem:[#allocation22 + $0x3]] (%p5755_p3), %s4452_s27  ;;  %s627_s11 = scalar_lea.sflag [#allocation6], %s626_s21 }
 0x10b   : > { %3873 = sst [smem:[#allocation22 + $0x4]] (%p5755_p3), %s4452_s27  ;;  %s3411_s4 = sshll.u32 %s641_s16, 26 }
 0x10c   : > { %3874 = sst [smem:[#allocation22 + $0x5]] (%p5755_p3), %s4453_s6  ;;  %s3412_s3 = sadd.s32 134217728, %s3411_s4 }
 0x10d   : > { %s4454_s17 = smov [#allocation21]  }
 0x10e   : > { %3875 = dma.general (%p5755_p3), %s636_s19, 640, %s650_s24, %s627_s11, %s4454_s17, [#allocation22], %s3412_s3, 0  }
 0x10f   : > { %s3413_s22 = sshll.u32 %s4824_s20, 5  ;;  %s5757_s18 = sld [smem:[#allocation43_spill]] }
 0x110   : > { %s3876_s1 = scalar_select %p5755_p3, [#allocation0], [#allocation28] }
 0x111   : > { %s4455_s4 = smov 256   ;;  %s676_s19 = scalar_lea.vmem [#allocation7], %s3413_s22 }
 0x112   : > { %3877 = sst [smem:[#allocation24]] (%p5755_p3), %s4455_s4  ;;  %s695_s24 = sshll.u32 %s676_s19, 4  ;;  %s696_s24 = int_to_ptr.vmem [resolvable:$true] %s695_s24 }
 0x113   : > { %s687_s21 = sld [smem:[%s3876_s1]]   ;;  %s4456_s6 = smov 128  }
 0x114   : > { %3878 = sst [smem:[#allocation24 + $0x1]] (%p5755_p3), %s4456_s6  ;;  %s4457_s3 = smov 2  }
 0x115   : > { %s682_s27 = scalar_lea.hbm %s5757_s18, %s3514_s14  ;;  %3879 = sst [smem:[#allocation24 + $0x2]] (%p5755_p3), %s4457_s3 }
 0x116   : > { %s4458_s20 = smov 64   ;;  %s4459_s17 = smov 4  }
 0x117   : > { %3880 = sst [smem:[#allocation24 + $0x3]] (%p5755_p3), %s4458_s20  ;;  %s4460_s9 = smov [#allocation23]  }
 0x118   : > { %3881 = sst [smem:[#allocation24 + $0x4]] (%p5755_p3), %s4458_s20 }
 0x119   : > { %s3416_s14 = sshll.u32 %s687_s21, 26  ;;  %3882 = sst [smem:[#allocation24 + $0x5]] (%p5755_p3), %s4459_s17 }
 0x11a   : > { %s3417_s1 = sadd.s32 134217728, %s3416_s14 }
 0x11b   : > { %3883 = dma.general (%p5755_p3), %s682_s27, 512, %s696_s24, %s627_s11, %s4460_s9, [#allocation24], %s3417_s1, 0  }
 0x11c PF: > { %p5758_p6 = scmp.ne.s32.totalorder %s5750_s26, 0 }
 0x11d   : > { %s4904_s22 = sand.u32 (!%p5758_p6), 1, %s4425_s28   ;;  %p5759_p13 = scmp.ne.s32.totalorder (!%p5758_p6), %s5745_s23, 0 }
 0x11e   : > { %720 = sbr.rel (%p5758_p6) target bundleno = 2082 (0x822), region = 88  ;;  %s723_s18 = scalar_lea.sflag (!%p5758_p6), [#allocation3], %s4904_s22 }
 0x11f   : > { %s3849_s16 = smul.u32 (!%p5758_p6), 20, %s4904_s22 }
 0x121   : > { %s4908_s4 = scalar_lea.vmem (!%p5758_p6), [#allocation2], %s3849_s16 }
 0x125   : > { %4392 = dma.done.wait (%p5759_p13), %s723_s18, 320  }
 0x126   : > { %4394 = vsyncadd (%p5759_p13), %s723_s18, 4294966976  ;;  %s731_s2 = sand.u32 1, %s4588_s0   ;;  %s3850_s26 = smul.u32 40, %s4904_s22 }
 0x127   : > { %s732_s11 = scalar_lea.sflag [#allocation6], %s731_s2 }
 0x128   : > { %s4916_s27 = scalar_lea.vmem [#allocation5], %s3850_s26 }
 0x129   : > { %4396 = dma.done.wait (%p5759_p13), %s732_s11, 1152  }
 0x12a   : > { %4398 = vsyncadd (%p5759_p13), %s732_s11, 4294966144  ;;  %s3419_s21 = sshll.u32 %s4904_s22, 5  ;;  %p5760_p3 = scmp.eq.s32.totalorder %s4588_s0, 0 }
 0x12b   : > { %s4923_s19 = scalar_lea.vmem [#allocation7], %s3419_s21 }
 0x12c   : > { %4400 = dma.done.wait (%p5760_p3), [#allocation9], 1536   ;;  %p5761_p0 = pmov %p5760_p3 }
 0x12e   : > { %4402 = vsyncadd (%p5761_p0), [#allocation9], 4294965760  ;;  %p5762_p7 = pmov %p5761_p0 }
 0x12f   : > { %p5763_p8 = pmov %p5761_p0 }
 0x130   : > { %4404 = dma.done.wait (%p5762_p7), [#allocation12], 1792  }
 0x131   : > { %4406 = vsyncadd (%p5763_p8), [#allocation12], 4294965504  ;;  %p5764_p9 = pmov %p5761_p0 }
 0x132   : > { %p5765_p10 = pmov %p5761_p0 }
 0x133   : > { %4408 = dma.done.wait (%p5764_p9), [#allocation15], 2048  }
 0x134   : > { %4410 = vsyncadd (%p5765_p10), [#allocation15], 4294965248  ;;  %p5766_p1 = pmov %p5761_p0 }
 0x135   : > { %p5767_p2 = pmov %p5761_p0 }
 0x136   : > { %4412 = dma.done.wait (%p5766_p1), [#allocation18], 2048  }
 0x137   : > { %4414 = vsyncadd (%p5767_p2), [#allocation18], 4294965248  ;;  %v5727_v0 = vmov 0.0   ;;  %vm4462_vm0 = vmmov 0   ;;  %v4025_v1 = vld [vmem:[#allocation8] sm:$0xff]   ;;  %v4026_v2 = vld [vmem:[#allocation8 + $0x8] sm:$0xff]  }
 0x138   : > { %3623 = vmatprep.subr.bf16.mxu0 %v5727_v0  ;;  %3631 = vmatprep.mubr.msk.bf16.mxu0 %vm4462_vm0, %v5727_v0  ;;  %v4027_v3 = vld [vmem:[#allocation8 + $0x10] sm:$0xff]   ;;  %v4032_v4 = vld [vmem:[#allocation10] sm:$0xff]   ;;  %v4033_v5 = vld [vmem:[#allocation10 + $0x8] sm:$0xff]   ;;  %vm906_vm1 = vcmask 523264   ;;  %s5768_s6 = sld [smem:[#allocation45_spill]]  ;;  %vm1313_vm2 = vcmask 785408  }
 0x139   : > { %3643 = vmatprep.subr.bf16.mxu1 %v5727_v0  ;;  %3659 = vmatprep.mubr.msk.bf16.mxu1 %vm4462_vm0, %v5727_v0  ;;  %v4028_v6 = vld [vmem:[#allocation8 + $0x18] sm:$0xff]   ;;  %v4034_v8 = vld [vmem:[#allocation10 + $0x10] sm:$0xff]   ;;  %v4036_v11 = vld [vmem:[#allocation10 + $0x20] sm:$0xff]   ;;  %s5769_s14 = sld [smem:[#allocation46_spill]]  ;;  %s5770_s9 = sld [smem:[#allocation47_spill]]  ;;  %vm3135_vm3 = vcmask 0  }
 0x13a   : > { %3624 = vmatpush3.bf16.msra.mxu0 %v4025_v1  ;;  %3644 = vmatpush3.bf16.msra.mxu1 %v4032_v4  ;;  %v4029_v7 = vld [vmem:[%s4908_s4] sm:$0xff]   ;;  %v4030_v10 = vld [vmem:[%s4908_s4 + $0x8] sm:$0xff]   ;;  %v4031_v13 = vld [vmem:[%s4908_s4 + $0x10] ss:$0 sps:$4 sm:$0xff]   ;;  %s5777_s4 = sld [smem:[#allocation48_spill]]  ;;  %s5778_s11 = sld [smem:[#allocation49_spill]] }
 0x13b   : > { %3625 = vmatprep.subr.bf16.mxu0 %v5727_v0  ;;  %3645 = vmatprep.subr.bf16.mxu1 %v5727_v0  ;;  %v4035_v9 = vld [vmem:[#allocation10 + $0x18] sm:$0xff]   ;;  %v4037_v12 = vld [vmem:[#allocation10 + $0x28] sm:$0xff]   ;;  %v4038_v14 = vld [vmem:[#allocation10 + $0x30] sm:$0xff]   ;;  %s5779_s24 = sld [smem:[#allocation50_spill]]  ;;  %p845_p5 = scmp.lt.s32.totalorder %s4588_s0, 1 }
 0x13c   : > { %v4039_v15 = vld [vmem:[#allocation10 + $0x38] sm:$0xff]   ;;  %v4041_v16 = vld [vmem:[#allocation11] sm:$0xff]   ;;  %v4043_v17 = vld [vmem:[#allocation11 + $0x8] sm:$0xff]   ;;  %s3138_s1 = scalar_lea.sflag [#allocation4], %s4904_s22 }
 0x13d   : > { %v4045_v18 = vld [vmem:[#allocation11 + $0x10] sm:$0xff]   ;;  %v4047_v19 = vld [vmem:[#allocation11 + $0x18] sm:$0xff]   ;;  %v4049_v20 = vld [vmem:[#allocation11 + $0x20] sm:$0xff]  }
 0x13e   : > { %3626 = vmatpush3.bf16.msra.mxu0 %v4026_v2  ;;  %3646 = vmatpush3.bf16.msra.mxu1 %v4033_v5  ;;  %v4051_v21 = vld [vmem:[#allocation11 + $0x28] sm:$0xff]   ;;  %v4040_v31 = vld [vmem:[#allocation13] sm:$0xff]   ;;  %v4044_v42 = vld [vmem:[#allocation13 + $0x10] sm:$0xff]  }
 0x13f   : > { %3627 = vmatprep.subr.bf16.mxu0 %v5727_v0  ;;  %3647 = vmatprep.subr.bf16.mxu1 %v5727_v0  ;;  %v3429_v22 = vld [vmem:[%s5768_s6] ss:$0 sm:$0xff]  ;;  %v4046_v48 = vld [vmem:[#allocation13 + $0x18] sm:$0xff]   ;;  %v4048_v52 = vld [vmem:[#allocation13 + $0x20] sm:$0xff]  }
 0x140   : > { %v4042_v37 = vld [vmem:[#allocation13 + $0x8] sm:$0xff]   ;;  %v4052_v54 = vld [vmem:[%s4916_s27] sm:$0xff]   ;;  %v4055_v57 = vld [vmem:[%s4916_s27 + $0x8] sm:$0xff]  }
 0x141   : > { %v4050_v53 = vld [vmem:[#allocation13 + $0x28] sm:$0xff]   ;;  %v4053_v55 = vld [vmem:[#allocation11 + $0x30] sm:$0xff]   ;;  %v4054_v56 = vld [vmem:[#allocation11 + $0x38] sm:$0xff]  }
 0x142   : > { %3628 = vmatpush3.bf16.msra.mxu0 %v4027_v3  ;;  %3648 = vmatpush3.bf16.msra.mxu1 %v4034_v8  ;;  %v4056_v58 = vld [vmem:[%s4916_s27 + $0x10] sm:$0xff]   ;;  %v4057_v59 = vld [vmem:[%s4916_s27 + $0x18] sm:$0xff]   ;;  %v4058_v60 = vld [vmem:[%s4916_s27 + $0x20] sm:$0xff]   ;;  %s3428_s27 = sshll.u32 %s4904_s22, 6 }
 0x143   : > { %3629 = vmatprep.subr.bf16.mxu0 %v5727_v0  ;;  %3649 = vmatprep.subr.bf16.mxu1 %v5727_v0  ;;  %v3440_v61 = vld [vmem:[%s5769_s14] ss:$0 sm:$0xff]  ;;  %v4059_v5 = vld [vmem:[#allocation14] sm:$0xff]   ;;  %s5563_s6 = scalar_lea.vmem [#allocation20], %s3428_s27  ;;  %s5780_s14 = sld [smem:[#allocation52_spill]] }
 0x146   : > { %3630 = vmatpush3.bf16.msra.mxu0 %v4028_v6  ;;  %3650 = vmatpush3.bf16.msra.mxu1 %v4035_v9 }
 0x147   : > { %3671 = vmatprep.subr.bf16.mxu0 %v5727_v0  ;;  %3651 = vmatprep.subr.bf16.mxu1 %v5727_v0 }
 0x149   : > { %3632 = vmatmul.mubr.msk.bf16.vlgmr.msra.gmra.mrb[0].mxu0 %vm906_vm1, %v4029_v7 }
 0x14a   : > { %3635 = vmatprep.mubr.msk.bf16.mxu0 %vm4462_vm0, %v5727_v0  ;;  %3652 = vmatpush3.bf16.msra.mxu1 %v4036_v11 }
 0x14b   : > { %3653 = vmatprep.subr.bf16.mxu1 %v5727_v0  ;;  %3672 = vmatpush3.bf16.msra.mxu0 %v4041_v16 }
 0x14c   : > { %3673 = vmatprep.subr.bf16.mxu0 %v5727_v0 }
 0x14e   : > { %3654 = vmatpush3.bf16.msra.mxu1 %v4037_v12 }
 0x14f   : > { %3655 = vmatprep.subr.bf16.mxu1 %v5727_v0  ;;  %3674 = vmatpush3.bf16.msra.mxu0 %v4043_v17 }
 0x150   : > { %3675 = vmatprep.subr.bf16.mxu0 %v5727_v0 }
 0x151   : > { %3636 = vmatmul.mubr.msk.bf16.gmra.mrb[4].mxu0 %vm906_vm1, %v4030_v10 }
 0x152   : > { %3639 = vmatprep.mubr.msk.bf16.mxu0 %vm4462_vm0, %v5727_v0  ;;  %3656 = vmatpush3.bf16.msra.mxu1 %v4038_v14 }
 0x153   : > { %3657 = vmatprep.subr.bf16.mxu1 %v5727_v0  ;;  %3676 = vmatpush3.bf16.msra.mxu0 %v4045_v18 }
 0x154   : > { %3677 = vmatprep.subr.bf16.mxu0 %v5727_v0 }
 0x156   : > { %3658 = vmatpush3.bf16.msra.mxu1 %v4039_v15 }
 0x157   : > { %3699 = vmatprep.subr.bf16.mxu1 %v5727_v0  ;;  %3678 = vmatpush3.bf16.msra.mxu0 %v4047_v19 }
 0x158   : > { %3679 = vmatprep.subr.bf16.mxu0 %v5727_v0 }
 0x159   : > { %3640 = vmatmul.mubr.msk.bf16.gmra.mrb[8].mxu0 %vm906_vm1, %v4031_v13 }
 0x15a   : > { %3687 = vmatprep.mubr.msk.bf16.mxu0 %vm4462_vm0, %v5727_v0 }
 0x15b   : > { %3680 = vmatpush3.bf16.msra.mxu0 %v4049_v20  ;;  %v4060_v20 = vld [vmem:[#allocation14 + $0x8] sm:$0xff]  }
 0x15c   : > { %3681 = vmatprep.subr.bf16.mxu0 %v5727_v0 }
 0x15f   : > { %3682 = vmatpush3.bf16.msra.mxu0 %v4051_v21 }
 0x160   : > { %3683 = vmatprep.subr.bf16.mxu0 %v5727_v0 }
 0x163   : > { %3684 = vmatpush3.bf16.msra.mxu0 %v4053_v55  ;;  %v4073_v55 = vld [vmem:[#allocation16 + $0x20] sm:$0xff]  }
 0x164   : > { %3685 = vmatprep.subr.bf16.mxu0 %v5727_v0 }
 0x167   : > { %3686 = vmatpush3.bf16.msra.mxu0 %v4054_v56 }
 0x168   : > { %3731 = vmatprep.subr.bf16.mxu0 %v5727_v0 }
 0x21c   : > { %v950_v23 = vpop.f32.mrb[0].mxu0 }
 0x21d   : > { %v951_v24 = vadd.f32 %v3429_v22, %v950_v23  ;;  %v3633_v25 = vpop.f32.mrb[1].mxu0 }
 0x21e   : > { %v953_v26 = vpop.f32.mrb[2].mxu0  ;;  %v4061_v25 = vld [vmem:[#allocation14 + $0x10] sm:$0xff]  }
 0x21f   : > { %v954_v27 = vadd.f32 %v3429_v22, %v953_v26  ;;  %v3634_v28 = vpop.f32.mrb[3].mxu0  ;;  %v972_v29 = vmax.f32 %v951_v24, 0.0 }
 0x221   : > { %v973_v30 = vmax.f32 %v954_v27, 0.0 }
 0x223   : > { %v977_v32 = vpack.c.bf16 %v973_v30, %v972_v29  ;;  %v4062_v29 = vld [vmem:[#allocation14 + $0x18] sm:$0xff]  }
 0x224   : > { %v958_v33 = vpop.f32.mrb[4].mxu0 }
 0x225   : > { %v959_v34 = vadd.f32 %v3429_v22, %v958_v33  ;;  %v3637_v35 = vpop.f32.mrb[5].mxu0  ;;  %3660 = vmatmul.mubr.bf16.vlgmr.msra.gmra.mrb[0].mxu1 %v977_v32  ;;  %v4063_v33 = vld [vmem:[#allocation14 + $0x20] sm:$0xff]  }
 0x226   : > { %v961_v36 = vpop.f32.mrb[6].mxu0  ;;  %3663 = vmatprep.mubr.msk.bf16.mxu1 %vm4462_vm0, %v5727_v0  ;;  %3700 = vmatpush3.bf16.msra.mxu1 %v4040_v31 }
 0x227   : > { %v974_v38 = vmax.f32 %v959_v34, 0.0  ;;  %v962_v39 = vadd.f32 %v3429_v22, %v961_v36  ;;  %v3638_v40 = vpop.f32.mrb[7].mxu0  ;;  %3701 = vmatprep.subr.bf16.mxu1 %v5727_v0 }
 0x229   : > { %v975_v41 = vmax.f32 %v962_v39, 0.0  ;;  %v4064_v39 = vld [vmem:[#allocation14 + $0x28] sm:$0xff]  }
 0x22a   : > { %3702 = vmatpush3.bf16.msra.mxu1 %v4042_v37 }
 0x22b   : > { %v978_v43 = vpack.c.bf16 %v975_v41, %v974_v38  ;;  %3703 = vmatprep.subr.bf16.mxu1 %v5727_v0  ;;  %v4065_v41 = vld [vmem:[#allocation14 + $0x30] sm:$0xff]  }
 0x22c   : > { %v966_v44 = vpop.f32.mrb[8].mxu0 }
 0x22d   : > { %3664 = vmatmul.mubr.bf16.gmra.mrb[4].mxu1 %v978_v43  ;;  %v967_v45 = vadd.f32 %v3429_v22, %v966_v44  ;;  %v3641_v46 = vpop.f32.mrb[9].mxu0 }
 0x22e   : > { %v969_v47 = vpop.f32.mrb[10].mxu0  ;;  %3667 = vmatprep.mubr.msk.bf16.mxu1 %vm4462_vm0, %v5727_v0  ;;  %3704 = vmatpush3.bf16.msra.mxu1 %v4044_v42  ;;  %v4066_v42 = vld [vmem:[#allocation14 + $0x38] sm:$0xff]  }
 0x22f   : > { %v976_v49 = vmax.f32 %v967_v45, 0.0  ;;  %v3642_v50 = vpop.f32.mrb[11].mxu0  ;;  %3705 = vmatprep.subr.bf16.mxu1 %v5727_v0  ;;  %v4067_v47 = vld [vmem:[#allocation16] sm:$0xff]  }
 0x230   : > { %v4463_v50 = vmov 1983009808  }
 0x231   : > { %v979_v51 = vpack.c.bf16 %v976_v49, %v976_v49  ;;  %v4070_v49 = vld [vmem:[#allocation16 + $0x10] sm:$0xff]  }
 0x232   : > { %3706 = vmatpush3.bf16.msra.mxu1 %v4046_v48  ;;  %v4068_v48 = vld [vmem:[#allocation16 + $0x8] sm:$0xff]  }
 0x233   : > { %3707 = vmatprep.subr.bf16.mxu1 %v5727_v0 }
 0x235   : > { %3668 = vmatmul.mubr.bf16.gmra.mrb[8].mxu1 %v979_v51  ;;  %v1414_v51 = vunpack.c.l.s4 %v4463_v50 }
 0x236   : > { %3708 = vmatpush3.bf16.msra.mxu1 %v4048_v52  ;;  %3711 = vmatprep.mubr.msk.bf16.mxu1 %vm4462_vm0, %v5727_v0  ;;  %v4071_v52 = vld [vmem:[#allocation16 + $0x18] sm:$0xff]  }
 0x237   : > { %3709 = vmatprep.subr.bf16.mxu1 %v5727_v0 }
 0x23a   : > { %3710 = vmatpush3.bf16.msra.mxu1 %v4050_v53  ;;  %v1416_v53 = vlaneseq }
 0x23b   : > { %3767 = vmatprep.subr.bf16.mxu1 %v5727_v0 }
 0x23c   : > { %v1417_v56 = vshrl.u32 %v1416_v53, 7 }
 0x23d   : > { %3712 = vmatmul.mubr.msk.bf16.vlgmr.msra.gmra.mrb[12].mxu1 %vm1313_vm2, %v4052_v54  ;;  %v1415_v54 = vunpack.c.0.s8 %v1414_v51 }
 0x23e   : > { %3715 = vmatprep.mubr.msk.bf16.mxu1 %vm4462_vm0, %v5727_v0  ;;  %3768 = vmatpush3.bf16.msra.mxu1 %v4067_v47 }
 0x23f   : > { %3769 = vmatprep.subr.bf16.mxu1 %v5727_v0 }
 0x242   : > { %3770 = vmatpush3.bf16.msra.mxu1 %v4068_v48 }
 0x243   : > { %3771 = vmatprep.subr.bf16.mxu1 %v5727_v0 }
 0x245   : > { %3716 = vmatmul.mubr.msk.bf16.gmra.mrb[16].mxu1 %vm1313_vm2, %v4055_v57  ;;  %v4464_v57 = vmov 1966171168  }
 0x246   : > { %3719 = vmatprep.mubr.msk.bf16.mxu1 %vm4462_vm0, %v5727_v0  ;;  %3772 = vmatpush3.bf16.msra.mxu1 %v4070_v49 }
 0x247   : > { %3773 = vmatprep.subr.bf16.mxu1 %v5727_v0 }
 0x24a   : > { %3774 = vmatpush3.bf16.msra.mxu1 %v4071_v52 }
 0x24b   : > { %3775 = vmatprep.subr.bf16.mxu1 %v5727_v0 }
 0x24d   : > { %3720 = vmatmul.mubr.msk.bf16.gmra.mrb[20].mxu1 %vm1313_vm2, %v4056_v58  ;;  %v1629_v58 = vunpack.c.l.s4 %v4464_v57 }
 0x24e   : > { %3723 = vmatprep.mubr.msk.bf16.mxu1 %vm4462_vm0, %v5727_v0  ;;  %3776 = vmatpush3.bf16.msra.mxu1 %v4073_v55 }
 0x24f   : > { %3777 = vmatprep.subr.bf16.mxu1 %v5727_v0 }
 0x255   : > { %3724 = vmatmul.mubr.msk.bf16.gmra.mrb[24].mxu1 %vm1313_vm2, %v4057_v59  ;;  %v5055_v59 = vsub.s32 %v1415_v54, %v1417_v56 }
 0x256   : > { %3727 = vmatprep.mubr.msk.bf16.mxu1 %vm4462_vm0, %v5727_v0 }
 0x25d   : > { %3728 = vmatmul.mubr.msk.bf16.gmra.mrb[28].mxu1 %vm1313_vm2, %v4058_v60  ;;  %v4075_v60 = vld [vmem:[#allocation16 + $0x28] sm:$0xff]  }
 0x25e   : > { %3783 = vmatprep.mubr.msk.bf16.mxu1 %vm4462_vm0, %v5727_v0  ;;  %3778 = vmatpush3.bf16.msra.mxu1 %v4075_v60 }
 0x25f   : > { %3779 = vmatprep.subr.bf16.mxu1 %v5727_v0 }
 0x2f8   : > { %v1085_v62 = vpop.f32.mrb[0].mxu1 }
 0x2f9   : > { %v3661_v63 = vpop.f32.mrb[1].mxu1  ;;  %v1086_v2 = vadd.f32 %v3440_v61, %v1085_v62  ;;  %v1630_v62 = vunpack.c.0.s8 %v1629_v58 }
 0x2fa   : > { %v1088_v1 = vpop.f32.mrb[2].mxu1 }
 0x2fb   : > { %v1089_v3 = vadd.f32 %v3440_v61, %v1088_v1  ;;  %v3662_v4 = vpop.f32.mrb[3].mxu1 }
 0x2fd   : > { %v1107_v6 = vpack.c.bf16 %v1089_v3, %v1086_v2 }
 0x2ff   : > { %3688 = vmatmul.mubr.bf16.vlgmr.msra.gmra.mrb[12].mxu0 %v1107_v6 }
 0x300   : > { %v1093_v7 = vpop.f32.mrb[4].mxu1  ;;  %3691 = vmatprep.mubr.msk.bf16.mxu0 %vm4462_vm0, %v5727_v0  ;;  %3732 = vmatpush3.bf16.msra.mxu0 %v4059_v5 }
 0x301   : > { %v1094_v8 = vadd.f32 %v3440_v61, %v1093_v7  ;;  %v3665_v9 = vpop.f32.mrb[5].mxu1  ;;  %3733 = vmatprep.subr.bf16.mxu0 %v5727_v0  ;;  %v5080_v7 = vsub.s32 %v1630_v62, %v1417_v56 }
 0x302   : > { %v1096_v10 = vpop.f32.mrb[6].mxu1 }
 0x303   : > { %v1097_v11 = vadd.f32 %v3440_v61, %v1096_v10  ;;  %v3666_v12 = vpop.f32.mrb[7].mxu1 }
 0x304   : > { %3734 = vmatpush3.bf16.msra.mxu0 %v4060_v20 }
 0x305   : > { %v1108_v13 = vpack.c.bf16 %v1097_v11, %v1094_v8  ;;  %3735 = vmatprep.subr.bf16.mxu0 %v5727_v0  ;;  %v5082_v8 = vsub.s32 0, %v1417_v56 }
 0x307   : > { %3692 = vmatmul.mubr.bf16.gmra.mrb[16].mxu0 %v1108_v13 }
 0x308   : > { %v1101_v14 = vpop.f32.mrb[8].mxu1  ;;  %3695 = vmatprep.mubr.msk.bf16.mxu0 %vm4462_vm0, %v5727_v0  ;;  %3736 = vmatpush3.bf16.msra.mxu0 %v4061_v25 }
 0x309   : > { %v1102_v15 = vadd.f32 %v3440_v61, %v1101_v14  ;;  %v3669_v16 = vpop.f32.mrb[9].mxu1  ;;  %3737 = vmatprep.subr.bf16.mxu0 %v5727_v0 }
 0x30a   : > { %v1104_v17 = vpop.f32.mrb[10].mxu1 }
 0x30b   : > { %v1109_v18 = vpack.c.bf16 %v1102_v15, %v1102_v15  ;;  %v3670_v19 = vpop.f32.mrb[11].mxu1 }
 0x30c   : > { %3738 = vmatpush3.bf16.msra.mxu0 %v4062_v29 }
 0x30d   : > { %3739 = vmatprep.subr.bf16.mxu0 %v5727_v0 }
 0x30f   : > { %3696 = vmatmul.mubr.bf16.gmra.mrb[20].mxu0 %v1109_v18 }
 0x310   : > { %3747 = vmatprep.mubr.msk.bf16.mxu0 %vm4462_vm0, %v5727_v0  ;;  %v5024_v21 = vpop.f32.mrb[12].mxu1  ;;  %3740 = vmatpush3.bf16.msra.mxu0 %v4063_v33 }
 0x311   : > { %v3713_v22 = vpop.f32.mrb[13].mxu1  ;;  %3741 = vmatprep.subr.bf16.mxu0 %v5727_v0  ;;  %v1412_v61 = vcombine.high %v5024_v21, %v5024_v21  ;;  %v5064_v1 = vrot.slane %v5024_v21, %v5055_v59 }
 0x312   : > { %v5027_v23 = vpop.f32.mrb[14].mxu1 }
 0x313   : > { %v3714_v24 = vpop.f32.mrb[15].mxu1  ;;  %v1429_v63 = vcombine.high %v5027_v23, %v5027_v23  ;;  %v5069_v3 = vrot.slane %v1412_v61, %v5055_v59  ;;  %v5073_v4 = vrot.slane %v5027_v23, %v5055_v59  ;;  %v1427_v10 = vcombine.high %v5064_v1, %v5064_v1 }
 0x314   : > { %3742 = vmatpush3.bf16.msra.mxu0 %v4064_v39 }
 0x315   : > { %3743 = vmatprep.subr.bf16.mxu0 %v5727_v0  ;;  %v5085_v9 = vrot.slane %v1429_v63, %v5055_v59  ;;  %v1428_v14 = vcombine.high %v5069_v3, %v5069_v3  ;;  %v1444_v15 = vcombine.high %v5073_v4, %v5073_v4 }
 0x317   : > { %v1445_v22 = vcombine.high %v5085_v9, %v5085_v9 }
 0x318   : > { %v5030_v26 = vpop.f32.mrb[16].mxu1  ;;  %3744 = vmatpush3.bf16.msra.mxu0 %v4065_v41 }
 0x319   : > { %v3717_v27 = vpop.f32.mrb[17].mxu1  ;;  %3745 = vmatprep.subr.bf16.mxu0 %v5727_v0  ;;  %v1446_v2 = vcombine.high %v5030_v26, %v5030_v26  ;;  %v5091_v11 = vrot.slane %v5030_v26, %v5055_v59 }
 0x31a   : > { %v5032_v28 = vpop.f32.mrb[18].mxu1 }
 0x31b   : > { %v3718_v30 = vpop.f32.mrb[19].mxu1  ;;  %v1463_v5 = vcombine.high %v5032_v28, %v5032_v28  ;;  %v5094_v12 = vrot.slane %v1446_v2, %v5055_v59  ;;  %v5108_v18 = vrot.slane %v5032_v28, %v5055_v59  ;;  %v1461_v26 = vcombine.high %v5091_v11, %v5091_v11 }
 0x31c   : > { %3746 = vmatpush3.bf16.msra.mxu0 %v4066_v42 }
 0x31d   : > { %3795 = vmatprep.subr.bf16.mxu0 %v5727_v0  ;;  %v5111_v19 = vrot.slane %v1463_v5, %v5055_v59  ;;  %v1462_v27 = vcombine.high %v5094_v12, %v5094_v12 }
 0x320   : > { %v5035_v31 = vpop.f32.mrb[20].mxu1 }
 0x321   : > { %v3721_v32 = vpop.f32.mrb[21].mxu1  ;;  %v1480_v6 = vcombine.high %v5035_v31, %v5035_v31  ;;  %v5115_v20 = vrot.slane %v5035_v31, %v5055_v59 }
 0x322   : > { %v5037_v34 = vpop.f32.mrb[22].mxu1 }
 0x323   : > { %v3722_v35 = vpop.f32.mrb[23].mxu1  ;;  %v1497_v13 = vcombine.high %v5037_v34, %v5037_v34  ;;  %v5118_v21 = vrot.slane %v1480_v6, %v5055_v59  ;;  %v5136_v28 = vrot.slane %v5037_v34, %v5055_v59  ;;  %v1478_v34 = vcombine.high %v5108_v18, %v5108_v18 }
 0x324   : > { %v1479_v35 = vcombine.high %v5111_v19, %v5111_v19 }
 0x325   : > { %v5139_v29 = vrot.slane %v1497_v13, %v5055_v59  ;;  %v1512_v47 = vcombine.high %v5136_v28, %v5136_v28 }
 0x327   : > { %v1513_v48 = vcombine.high %v5139_v29, %v5139_v29 }
 0x328   : > { %v5040_v36 = vpop.f32.mrb[24].mxu1 }
 0x329   : > { %v3725_v37 = vpop.f32.mrb[25].mxu1  ;;  %v1514_v16 = vcombine.high %v5040_v36, %v5040_v36  ;;  %v5124_v23 = vrot.slane %v5040_v36, %v5055_v59  ;;  %v1495_v36 = vcombine.high %v5115_v20, %v5115_v20 }
 0x32a   : > { %v5042_v38 = vpop.f32.mrb[26].mxu1  ;;  %v1496_v37 = vcombine.high %v5118_v21, %v5118_v21 }
 0x32b   : > { %v3726_v40 = vpop.f32.mrb[27].mxu1  ;;  %v1531_v17 = vcombine.high %v5042_v38, %v5042_v38  ;;  %v5142_v30 = vrot.slane %v1514_v16, %v5055_v59  ;;  %v5146_v31 = vrot.slane %v5042_v38, %v5055_v59  ;;  %v1529_v39 = vcombine.high %v5124_v23, %v5124_v23 }
 0x32d   : > { %v5149_v32 = vrot.slane %v1531_v17, %v5055_v59  ;;  %v1530_v50 = vcombine.high %v5142_v30, %v5142_v30 }
 0x330   : > { %v5047_v43 = vpop.f32.mrb[28].mxu1 }
 0x331   : > { %v3729_v44 = vpop.f32.mrb[29].mxu1  ;;  %v1548_v24 = vcombine.high %v5047_v43, %v5047_v43  ;;  %v5153_v33 = vrot.slane %v5047_v43, %v5055_v59 }
 0x332   : > { %v5049_v45 = vpop.f32.mrb[30].mxu1 }
 0x333   : > { %v3730_v46 = vpop.f32.mrb[31].mxu1  ;;  %v1565_v25 = vcombine.high %v5049_v45, %v5049_v45  ;;  %v5166_v40 = vrot.slane %v1548_v24, %v5055_v59  ;;  %v5170_v41 = vrot.slane %v5049_v45, %v5055_v59  ;;  %v1546_v45 = vcombine.high %v5146_v31, %v5146_v31 }
 0x335   : > { %v5173_v42 = vrot.slane %v1565_v25, %v5055_v59 }
 0x3d2   : > { %v1208_v38 = vpop.f32.mrb[12].mxu0 }
 0x3d3   : > { %v1627_v43 = vcombine.high %v1208_v38, %v1208_v38  ;;  %v1634_v44 = vrot.slane %v1208_v38, %v5080_v7  ;;  %v3689_v46 = vpop.f32.mrb[13].mxu0 }
 0x3d4   : > { %v1211_v49 = vpop.f32.mrb[14].mxu0  ;;  %v5207_v46 = vld [vmem:[%s5770_s9] ss:$0 sm:$0xff] }
 0x3d5   : > { %v1641_v53 = vrot.slane %v1627_v43, %v5080_v7  ;;  %v1642_v54 = vcombine.high %v1634_v44, %v1634_v44  ;;  %v1650_v55 = vrot.slane %v1634_v44, %v5080_v7  ;;  %v1676_v56 = vcombine.high %v1211_v49, %v1211_v49  ;;  %v3690_v57 = vpop.f32.mrb[15].mxu0 }
 0x3d6   : > { %v1683_v58 = vrot.slane %v1211_v49, %v5080_v7 }
 0x3d7   : > { %v1643_v63 = vcombine.high %v1641_v53, %v1641_v53  ;;  %v1657_v2 = vrot.slane %v1641_v53, %v5080_v7  ;;  %v1664_v5 = vrot.slane %v1642_v54, %v5080_v7  ;;  %v1672_v6 = vcombine.high %v1650_v55, %v1650_v55 }
 0x3d8   : > { %v1875_v13 = vrot.slane %v1650_v55, %v5082_v8  ;;  %v1690_v16 = vrot.slane %v1676_v56, %v5080_v7  ;;  %v1691_v17 = vcombine.high %v1683_v58, %v1683_v58  ;;  %v1699_v24 = vrot.slane %v1683_v58, %v5080_v7 }
 0x3d9   : > { %v1671_v25 = vrot.slane %v1643_v63, %v5080_v7  ;;  %v1673_v38 = vcombine.high %v1657_v2, %v1657_v2  ;;  %v1674_v43 = vcombine.high %v1664_v5, %v1664_v5  ;;  %v1879_v44 = vrot.slane %v1664_v5, %v5082_v8 }
 0x3da   : > { %v1883_v49 = vrot.slane %v1672_v6, %v5082_v8  ;;  %v2072_v53 = vadd.f32 %v1875_v13, %v5064_v1  ;;  %v1692_v54 = vcombine.high %v1690_v16, %v1690_v16  ;;  %v5212_v55 = vrot.slane %v1690_v16, %v5080_v7  ;;  %v5214_v56 = vpop.f32.mrb[16].mxu0 }
 0x3db   : > { %v1675_v57 = vcombine.high %v1671_v25, %v1671_v25  ;;  %v1887_v58 = vrot.slane %v1674_v43, %v5082_v8  ;;  %v2073_v63 = vadd.f32 %v1879_v44, %v1427_v10  ;;  %v1713_v5 = vrot.slane %v1691_v17, %v5080_v7  ;;  %v3693_v62 = vpop.f32.mrb[17].mxu0 }
 0x3dc   : > { %v2074_v6 = vadd.f32 %v1883_v49, %v5069_v3  ;;  %v2119_v13 = vadd.f32 %v5207_v46, %v2072_v53  ;;  %v5224_v61 = vrot.slane %v1692_v54, %v5080_v7  ;;  %v1721_v16 = vcombine.high %v1699_v24, %v1699_v24  ;;  %v5226_v60 = vpop.f32.mrb[18].mxu0 }
 0x3dd   : > { %v2075_v43 = vadd.f32 %v1887_v58, %v1428_v14  ;;  %v2120_v1 = vadd.f32 %v5207_v46, %v2073_v63  ;;  %v1722_v10 = vcombine.high %v5212_v55, %v5212_v55  ;;  %v1723_v62 = vcombine.high %v1713_v5, %v1713_v5  ;;  %v3694_v17 = vpop.f32.mrb[19].mxu0 }
 0x3de   : > { %v2121_v44 = vadd.f32 %v5207_v46, %v2074_v6  ;;  %v2159_v49 = vmax.f32 %v2119_v13, 0.0  ;;  %v1724_v53 = vcombine.high %v5224_v61, %v5224_v61  ;;  %v1891_v54 = vrot.slane %v1657_v2, %v5082_v8 }
 0x3df   : > { %v2122_v52 = vadd.f32 %v5207_v46, %v2075_v43  ;;  %v2160_v0 = vmax.f32 %v2120_v1, 0.0  ;;  %v1895_v3 = vrot.slane %v1671_v25, %v5082_v8  ;;  %v1899_v14 = vrot.slane %v1673_v38, %v5082_v8 }
 0x3e0   : > { %v2161_v58 = vmax.f32 %v2121_v44, 0.0  ;;  %v1903_v63 = vrot.slane %v1675_v57, %v5082_v8  ;;  %v2076_v17 = vadd.f32 %v1891_v54, %v5073_v4  ;;  %v1907_v6 = vrot.slane %v1699_v24, %v5082_v8 }
 0x3e1   : > { %v2162_v13 = vmax.f32 %v2122_v52, 0.0  ;;  %v2239_v51 = vcombine.low %v2159_v49, %v2160_v0  ;;  %v2077_v2 = vadd.f32 %v1895_v3, %v1444_v15  ;;  %v2078_v43 = vadd.f32 %v1899_v14, %v5085_v9 }
 0x3e2   : > { %v2079_v25 = vadd.f32 %v1903_v63, %v1445_v22  ;;  %v2123_v38 = vadd.f32 %v5207_v46, %v2076_v17  ;;  %v1911_v57 = vrot.slane %v1713_v5, %v5082_v8  ;;  %v1915_v1 = vrot.slane %v1721_v16, %v5082_v8  ;;  %v5254_v44 = vpop.f32.mrb[20].mxu0 }
 0x3e3   : > { %v2240_v52 = vcombine.low %v2161_v58, %v2162_v13  ;;  %v2247_v0 = vrot.slane %v2239_v51, %v5055_v59  ;;  %v2124_v4 = vadd.f32 %v5207_v46, %v2077_v2  ;;  %v2125_v15 = vadd.f32 %v5207_v46, %v2078_v43  ;;  %v3697_v24 = vpop.f32.mrb[21].mxu0 }
 0x3e4   : > { %v2126_v49 = vadd.f32 %v5207_v46, %v2079_v25  ;;  %v2163_v9 = vmax.f32 %v2123_v38, 0.0  ;;  %v1919_v22 = vrot.slane %v1723_v62, %v5082_v8  ;;  %v2080_v54 = vadd.f32 %v1907_v6, %v5091_v11  ;;  %v1227_v5 = vpop.f32.mrb[22].mxu0 }
 0x3e5   : > { %v2254_v16 = vrot.slane %v2240_v52, %v5055_v59  ;;  %v2164_v3 = vmax.f32 %v2124_v4, 0.0  ;;  %v2165_v14 = vmax.f32 %v2125_v15, 0.0  ;;  %v2081_v51 = vadd.f32 %v1911_v57, %v1461_v26  ;;  %v3698_v58 = vpop.f32.mrb[23].mxu0 }
 0x3e6   : > { %v2166_v63 = vmax.f32 %v2126_v49, 0.0  ;;  %v2082_v17 = vadd.f32 %v1915_v1, %v5094_v12  ;;  %v2083_v13 = vadd.f32 %v1919_v22, %v1462_v27  ;;  %v2127_v62 = vadd.f32 %v5207_v46, %v2080_v54 }
 0x3e7   : > { %v5271_v6 = vcombine.low %v2247_v0, %v2254_v16  ;;  %v2256_v2 = vcombine.low %v2163_v9, %v2164_v3  ;;  %v2128_v43 = vadd.f32 %v5207_v46, %v2081_v51  ;;  %v1725_v25 = vcombine.high %v5214_v56, %v5214_v56 }
 0x3e8   : > { %v2257_v11 = vcombine.low %v2165_v14, %v2166_v63  ;;  %v5277_v26 = vadd.f32 %v5207_v46, %v2082_v17  ;;  %v5280_v38 = vadd.f32 %v5207_v46, %v2083_v13  ;;  %v2167_v57 = vmax.f32 %v2127_v62, 0.0 }
 0x3e9   : > { %v2264_v12 = vrot.slane %v2256_v2, %v5055_v59  ;;  %v2168_v27 = vmax.f32 %v2128_v43, 0.0  ;;  %v1732_v1 = vrot.slane %v5214_v56, %v5080_v7  ;;  %v1739_v52 = vrot.slane %v1725_v25, %v5080_v7 }
 0x3ea   : > { %v2271_v0 = vrot.slane %v2257_v11, %v5055_v59  ;;  %v2169_v4 = vmax.f32 %v5277_v26, 0.0  ;;  %v2170_v15 = vmax.f32 %v5280_v38, 0.0  ;;  %v1923_v24 = vrot.slane %v5212_v55, %v5082_v8 }
 0x3eb   : > { %v5291_v49 = vcombine.low %v2167_v57, %v2168_v27  ;;  %v1740_v9 = vcombine.high %v1732_v1, %v1732_v1  ;;  %v1741_v22 = vcombine.high %v1739_v52, %v1739_v52  ;;  %v1748_v54 = vrot.slane %v1732_v1, %v5080_v7 }
 0x3ec   : > { %v5294_v5 = vcombine.low %v2264_v12, %v2271_v0  ;;  %v1755_v56 = vrot.slane %v1739_v52, %v5080_v7  ;;  %v1927_v16 = vrot.slane %v5224_v61, %v5082_v8  ;;  %v1931_v3 = vrot.slane %v1722_v10, %v5082_v8 }
 0x3ed   : > { %v1762_v14 = vrot.slane %v1740_v9, %v5080_v7  ;;  %v1769_v51 = vrot.slane %v1741_v22, %v5080_v7  ;;  %v1770_v58 = vcombine.high %v1748_v54, %v1748_v54  ;;  %v1935_v63 = vrot.slane %v1724_v53, %v5082_v8 }
 0x3ee   : > { %v1771_v17 = vcombine.high %v1755_v56, %v1755_v56  ;;  %v2084_v13 = vadd.f32 %v1923_v24, %v5108_v18  ;;  %v2085_v62 = vadd.f32 %v1927_v16, %v1478_v34  ;;  %v2086_v55 = vadd.f32 %v1931_v3, %v5111_v19 }
 0x3ef   : > { %v1772_v10 = vcombine.high %v1762_v14, %v1762_v14  ;;  %v1773_v2 = vcombine.high %v1769_v51, %v1769_v51  ;;  %v2087_v43 = vadd.f32 %v1935_v63, %v1479_v35  ;;  %v1774_v25 = vcombine.high %v5226_v60, %v5226_v60 }
 0x3f0   : > { %v2131_v61 = vadd.f32 %v5207_v46, %v2084_v13  ;;  %v2132_v53 = vadd.f32 %v5207_v46, %v2085_v62  ;;  %v5322_v11 = vadd.f32 %v5207_v46, %v2086_v55  ;;  %v1781_v18 = vrot.slane %v5226_v60, %v5080_v7 }
 0x3f1   : > { %v5327_v34 = vadd.f32 %v5207_v46, %v2087_v43  ;;  %v1788_v57 = vrot.slane %v1774_v25, %v5080_v7  ;;  %v1939_v19 = vrot.slane %v1748_v54, %v5082_v8  ;;  %v1943_v35 = vrot.slane %v1762_v14, %v5082_v8 }
 0x3f2   : > { %v2171_v12 = vmax.f32 %v2131_v61, 0.0  ;;  %v2172_v27 = vmax.f32 %v2132_v53, 0.0  ;;  %v2173_v1 = vmax.f32 %v5322_v11, 0.0  ;;  %v1789_v52 = vcombine.high %v1781_v18, %v1781_v18 }
 0x3f3   : > { %v2174_v0 = vmax.f32 %v5327_v34, 0.0  ;;  %v1790_v24 = vcombine.high %v1788_v57, %v1788_v57  ;;  %v1797_v9 = vrot.slane %v1781_v18, %v5080_v7  ;;  %v1804_v60 = vrot.slane %v1788_v57, %v5080_v7 }
 0x3f4   : > { %v5336_v22 = vcombine.low %v2171_v12, %v2172_v27  ;;  %v1811_v16 = vrot.slane %v1789_v52, %v5080_v7  ;;  %v1947_v54 = vrot.slane %v1770_v58, %v5082_v8  ;;  %v1951_v3 = vrot.slane %v1772_v10, %v5082_v8 }
 0x3f5   : > { %v1818_v14 = vrot.slane %v1790_v24, %v5080_v7  ;;  %v1819_v63 = vcombine.high %v1797_v9, %v1797_v9  ;;  %v1820_v13 = vcombine.high %v1804_v60, %v1804_v60  ;;  %v2088_v62 = vadd.f32 %v1939_v19, %v5115_v20 }
 0x3f6   : > { %v1821_v55 = vcombine.high %v1811_v16, %v1811_v16  ;;  %v2089_v43 = vadd.f32 %v1943_v35, %v1495_v36  ;;  %v2090_v25 = vadd.f32 %v1947_v54, %v5118_v21  ;;  %v2091_v61 = vadd.f32 %v1951_v3, %v1496_v37 }
 0x3f7   : > { %v1822_v58 = vcombine.high %v1818_v14, %v1818_v14  ;;  %v2135_v10 = vadd.f32 %v5207_v46, %v2088_v62  ;;  %v1955_v53 = vrot.slane %v1755_v56, %v5082_v8  ;;  %v1959_v18 = vrot.slane %v1769_v51, %v5082_v8 }
 0x3f8   : > { %v2136_v57 = vadd.f32 %v5207_v46, %v2089_v43  ;;  %v5355_v19 = vadd.f32 %v5207_v46, %v2090_v25  ;;  %v5358_v20 = vadd.f32 %v5207_v46, %v2091_v61  ;;  %v1963_v36 = vrot.slane %v1771_v17, %v5082_v8 }
 0x3f9   : > { %v2175_v35 = vmax.f32 %v2135_v10, 0.0  ;;  %v1967_v21 = vrot.slane %v1773_v2, %v5082_v8  ;;  %v2092_v37 = vadd.f32 %v1955_v53, %v5136_v28  ;;  %v2093_v56 = vadd.f32 %v1959_v18, %v1512_v47 }
 0x3fa   : > { %v2176_v51 = vmax.f32 %v2136_v57, 0.0  ;;  %v2177_v12 = vmax.f32 %v5355_v19, 0.0  ;;  %v2178_v27 = vmax.f32 %v5358_v20, 0.0  ;;  %v2094_v52 = vadd.f32 %v1963_v36, %v5139_v29 }
 0x3fb   : > { %v2095_v17 = vadd.f32 %v1967_v21, %v1513_v48  ;;  %v2139_v24 = vadd.f32 %v5207_v46, %v2092_v37  ;;  %v2140_v2 = vadd.f32 %v5207_v46, %v2093_v56  ;;  %v1971_v54 = vrot.slane %v1797_v9, %v5082_v8 }
 0x3fc   : > { %v5375_v3 = vcombine.low %v2175_v35, %v2176_v51  ;;  %v5378_v28 = vadd.f32 %v5207_v46, %v2094_v52  ;;  %v1975_v47 = vrot.slane %v1811_v16, %v5082_v8  ;;  %v1979_v62 = vrot.slane %v1819_v63, %v5082_v8 }
 0x3fd   : > { %v5383_v43 = vadd.f32 %v5207_v46, %v2095_v17  ;;  %v2179_v29 = vmax.f32 %v2139_v24, 0.0  ;;  %v2180_v48 = vmax.f32 %v2140_v2, 0.0  ;;  %v1983_v25 = vrot.slane %v1821_v55, %v5082_v8 }
 0x3fe   : > { %v2181_v61 = vmax.f32 %v5378_v28, 0.0  ;;  %v2096_v9 = vadd.f32 %v1971_v54, %v5124_v23  ;;  %v2097_v10 = vadd.f32 %v1975_v47, %v1529_v39  ;;  %v2098_v53 = vadd.f32 %v1979_v62, %v5142_v30 }
 0x3ff   : > { %v2182_v16 = vmax.f32 %v5383_v43, 0.0  ;;  %v5393_v63 = vcombine.low %v2179_v29, %v2180_v48  ;;  %v2099_v18 = vadd.f32 %v1983_v25, %v1530_v50  ;;  %v1987_v55 = vrot.slane %v1804_v60, %v5082_v8  ;;  %v4069_v29 = vld [vmem:[#allocation17] sm:$0xff]  }
 0x400   : > { %v2143_v57 = vadd.f32 %v5207_v46, %v2096_v9  ;;  %v2144_v36 = vadd.f32 %v5207_v46, %v2097_v10  ;;  %v5402_v35 = vadd.f32 %v5207_v46, %v2098_v53  ;;  %v1991_v23 = vrot.slane %v1818_v14, %v5082_v8 }
 0x401   : > { %v5406_v39 = vadd.f32 %v5207_v46, %v2099_v18  ;;  %v1995_v21 = vrot.slane %v1820_v13, %v5082_v8  ;;  %v1999_v37 = vrot.slane %v1822_v58, %v5082_v8  ;;  %v2100_v30 = vadd.f32 %v1987_v55, %v5146_v31 }
 0x402   : > { %v2183_v50 = vmax.f32 %v2143_v57, 0.0  ;;  %v2184_v60 = vmax.f32 %v2144_v36, 0.0  ;;  %v2185_v56 = vmax.f32 %v5402_v35, 0.0  ;;  %v2101_v51 = vadd.f32 %v1991_v23, %v1546_v45 }
 0x403   : > { %v2186_v52 = vmax.f32 %v5406_v39, 0.0  ;;  %v2102_v14 = vadd.f32 %v1995_v21, %v5149_v32  ;;  %v5771_v17 = vcombine.high %v5149_v32, %v5149_v32  ;;  %v2147_v58 = vadd.f32 %v5207_v46, %v2100_v30 }
 0x404   : > { %v5421_v24 = vcombine.low %v2183_v50, %v2184_v60  ;;  %v2148_v2 = vadd.f32 %v5207_v46, %v2101_v51  ;;  %v1823_v54 = vcombine.high %v5254_v44, %v5254_v44  ;;  %v1830_v31 = vrot.slane %v5254_v44, %v5080_v7 }
 0x405   : > { %v2103_v13 = vadd.f32 %v1999_v37, %v5771_v17  ;;  %v5429_v45 = vadd.f32 %v5207_v46, %v2102_v14  ;;  %v2187_v32 = vmax.f32 %v2147_v58, 0.0  ;;  %v2419_v62 = vpack.c.bf16 %v5294_v5, %v5271_v6 }
 0x406   : > { %v2188_v48 = vmax.f32 %v2148_v2, 0.0  ;;  %v1837_v25 = vrot.slane %v1823_v54, %v5080_v7  ;;  %v1838_v9 = vcombine.high %v1830_v31, %v1830_v31  ;;  %v1846_v10 = vrot.slane %v1830_v31, %v5080_v7  ;;  %v4074_v31 = vld [vmem:[#allocation17 + $0x10] sm:$0xff]  }
 0x407   : > { %v5432_v47 = vadd.f32 %v5207_v46, %v2103_v13  ;;  %v2189_v53 = vmax.f32 %v5429_v45, 0.0  ;;  %3748 = vmatmul.mubr.bf16.vlgmr.msra.gmra.mrb[24].mxu0 %v2419_v62  ;;  %v2274_v18 = vcombine.low %v2169_v4, %v2170_v15  ;;  %v2281_v6 = vrot.slane %v5291_v49, %v5055_v59  ;;  %v4072_v4 = vld [vmem:[#allocation17 + $0x8] sm:$0xff]  }
 0x408   : > { %v5446_v5 = vcombine.low %v2187_v32, %v2188_v48  ;;  %v1839_v55 = vcombine.high %v1837_v25, %v1837_v25  ;;  %v1853_v57 = vrot.slane %v1837_v25, %v5080_v7  ;;  %v1860_v36 = vrot.slane %v1838_v9, %v5080_v7  ;;  %3796 = vmatpush3.bf16.msra.mxu0 %v4069_v29 }
 0x409   : > { %v2190_v44 = vmax.f32 %v5432_v47, 0.0  ;;  %v5772_v23 = vmov 0.0   ;;  %v1868_v21 = vcombine.high %v1846_v10, %v1846_v10  ;;  %v2003_v37 = vrot.slane %v1846_v10, %v5082_v8 }
 0x40a   : > { %3751 = vmatprep.mubr.msk.bf16.mxu0 %vm4462_vm0, %v5772_v23  ;;  %v2288_v38 = vrot.slane %v2274_v18, %v5055_v59  ;;  %v2291_v26 = vcombine.low %v2173_v1, %v2174_v0  ;;  %v1867_v15 = vrot.slane %v1839_v55, %v5080_v7  ;;  %v1869_v49 = vcombine.high %v1853_v57, %v1853_v57 }
 0x40b   : > { %v1870_v30 = vcombine.high %v1860_v36, %v1860_v36  ;;  %v2007_v50 = vrot.slane %v1860_v36, %v5082_v8  ;;  %3797 = vmatprep.subr.bf16.mxu0 %v5772_v23  ;;  %v2011_v60 = vrot.slane %v1868_v21, %v5082_v8  ;;  %v2104_v51 = vadd.f32 %v2003_v37, %v5153_v33 }
 0x40c   : > { %v2019_v14 = vrot.slane %v1853_v57, %v5082_v8  ;;  %v2289_v34 = vcombine.low %v2281_v6, %v2288_v38  ;;  %v1871_v17 = vcombine.high %v1867_v15, %v1867_v15  ;;  %v5773_v1 = vcombine.high %v5153_v33, %v5153_v33  ;;  %3798 = vmatpush3.bf16.msra.mxu0 %v4072_v4  ;;  %v4076_v4 = vld [vmem:[#allocation17 + $0x18] sm:$0xff]  }
 0x40d   : > { %v2015_v11 = vrot.slane %v1870_v30, %v5082_v8  ;;  %v2023_v0 = vrot.slane %v1867_v15, %v5082_v8  ;;  %v2106_v13 = vadd.f32 %v2011_v60, %v5166_v40  ;;  %v2151_v58 = vadd.f32 %v5207_v46, %v2104_v51  ;;  %3799 = vmatprep.subr.bf16.mxu0 %v5772_v23 }
 0x40e   : > { %v2105_v7 = vadd.f32 %v2007_v50, %v5773_v1  ;;  %v2027_v2 = vrot.slane %v1869_v49, %v5082_v8  ;;  %v2108_v54 = vadd.f32 %v2019_v14, %v5170_v41  ;;  %v5774_v32 = vcombine.high %v5166_v40, %v5166_v40 }
 0x40f   : > { %v2031_v33 = vrot.slane %v1871_v17, %v5082_v8  ;;  %v5775_v48 = vcombine.high %v5170_v41, %v5170_v41  ;;  %v2153_v9 = vadd.f32 %v5207_v46, %v2106_v13  ;;  %v2191_v10 = vmax.f32 %v2151_v58, 0.0  ;;  %v4077_v13 = vld [vmem:[#allocation16 + $0x30] sm:$0xff]   ;;  %v4079_v58 = vld [vmem:[#allocation16 + $0x38] sm:$0xff]  }
 0x410   : > { %v2107_v62 = vadd.f32 %v2015_v11, %v5774_v32  ;;  %v2152_v29 = vadd.f32 %v5207_v46, %v2105_v7  ;;  %v2110_v18 = vadd.f32 %v2027_v2, %v5173_v42  ;;  %v2155_v6 = vadd.f32 %v5207_v46, %v2108_v54  ;;  %3800 = vmatpush3.bf16.msra.mxu0 %v4074_v31  ;;  %v4080_v2 = vld [vmem:[#allocation17 + $0x28] sm:$0xff]   ;;  %v4081_v54 = vld [vmem:[#allocation17 + $0x30] sm:$0xff]   ;;  %v4082_v31 = vld [vmem:[#allocation17 + $0x38] sm:$0xff]  }
 0x411   : > { %v2109_v25 = vadd.f32 %v2023_v0, %v5775_v48  ;;  %v5776_v57 = vcombine.high %v5173_v42, %v5173_v42  ;;  %v2193_v41 = vmax.f32 %v2153_v9, 0.0  ;;  %v2298_v38 = vrot.slane %v5336_v22, %v5055_v59  ;;  %3801 = vmatprep.subr.bf16.mxu0 %v5772_v23  ;;  %3780 = vmatpush3.bf16.msra.mxu1 %v4077_v13  ;;  %v4083_v32 = vld [vmem:[#allocation19] sm:$0xff]  }
 0x412   : > { %v2154_v40 = vadd.f32 %v5207_v46, %v2107_v62  ;;  %v2192_v55 = vmax.f32 %v2152_v29, 0.0  ;;  %v2157_v21 = vadd.f32 %v5207_v46, %v2110_v18  ;;  %v2195_v37 = vmax.f32 %v2155_v6, 0.0  ;;  %3781 = vmatprep.subr.bf16.mxu1 %v5772_v23  ;;  %v3474_v62 = vld [vmem:[%s5777_s4] ss:$0 sm:$0xff] }
 0x413   : > { %v2111_v8 = vadd.f32 %v2031_v33, %v5776_v57  ;;  %v2156_v36 = vadd.f32 %v5207_v46, %v2109_v25  ;;  %v2305_v60 = vrot.slane %v2291_v26, %v5055_v59  ;;  %v2308_v51 = vcombine.low %v2177_v12, %v2178_v27 }
 0x414   : > { %v2194_v15 = vmax.f32 %v2154_v40, 0.0  ;;  %v2375_v49 = vcombine.low %v2191_v10, %v2192_v55  ;;  %v2197_v42 = vmax.f32 %v2157_v21, 0.0  ;;  %v2315_v22 = vrot.slane %v5375_v3, %v5055_v59  ;;  %3802 = vmatpush3.bf16.msra.mxu0 %v4076_v4 }
 0x415   : > { %v2158_v30 = vadd.f32 %v5207_v46, %v2111_v8  ;;  %v2196_v50 = vmax.f32 %v2156_v36, 0.0  ;;  %v2325_v46 = vcombine.low %v2181_v61, %v2182_v16  ;;  %v2332_v11 = vrot.slane %v5393_v63, %v5055_v59  ;;  %3803 = vmatprep.subr.bf16.mxu0 %v5772_v23  ;;  %3782 = vmatpush3.bf16.msra.mxu1 %v4079_v58 }
 0x416   : > { %v2306_v1 = vcombine.low %v2298_v38, %v2305_v60  ;;  %v2322_v26 = vrot.slane %v2308_v51, %v5055_v59  ;;  %v2342_v19 = vcombine.low %v2185_v56, %v2186_v52  ;;  %v2349_v20 = vrot.slane %v5421_v24, %v5055_v59  ;;  %3823 = vmatprep.subr.bf16.mxu1 %v4083_v32 }
 0x417   : > { %v2198_v14 = vmax.f32 %v2158_v30, 0.0  ;;  %v2392_v17 = vcombine.low %v2195_v37, %v2196_v50  ;;  %v2339_v12 = vrot.slane %v2325_v46, %v5055_v59  ;;  %v2359_v27 = vcombine.low %v2189_v53, %v2190_v44 }
 0x418   : > { %v2366_v3 = vrot.slane %v5446_v5, %v5055_v59  ;;  %v2376_v28 = vcombine.low %v2193_v41, %v2194_v15  ;;  %v2420_v43 = vpack.c.bf16 %v2306_v1, %v2289_v34  ;;  %v2323_v61 = vcombine.low %v2315_v22, %v2322_v26 }
 0x419   : > { %v2356_v16 = vrot.slane %v2342_v19, %v5055_v59  ;;  %v2383_v63 = vrot.slane %v2375_v49, %v5055_v59  ;;  %v2340_v35 = vcombine.low %v2332_v11, %v2339_v12  ;;  %v2373_v39 = vrot.slane %v2359_v27, %v5055_v59  ;;  %v4084_v27 = vld [vmem:[#allocation19 + $0x8] sm:$0xff]  }
 0x41a   : > { %v2390_v56 = vrot.slane %v2376_v28, %v5055_v59  ;;  %v2393_v52 = vcombine.low %v2197_v42, %v2198_v14  ;;  %3752 = vmatmul.mubr.bf16.gmra.mrb[28].mxu0 %v2420_v43  ;;  %v2400_v45 = vrot.slane %v2392_v17, %v5055_v59  ;;  %v4086_v28 = vld [vmem:[#allocation19 + $0x18] sm:$0xff]   ;;  %v4087_v43 = vld [vmem:[#allocation19 + $0x20] sm:$0xff]  }
 0x41b   : > { %v2357_v24 = vcombine.low %v2349_v20, %v2356_v16  ;;  %3755 = vmatprep.mubr.msk.bf16.mxu0 %vm4462_vm0, %v5772_v23  ;;  %v2421_v47 = vpack.c.bf16 %v2340_v35, %v2323_v61  ;;  %v2374_v53 = vcombine.low %v2366_v3, %v2373_v39  ;;  %v4085_v3 = vld [vmem:[#allocation19 + $0x10] sm:$0xff]   ;;  %v4090_v16 = vld [vmem:[#allocation19 + $0x38] sm:$0xff]  }
 0x41c   : > { %v2391_v44 = vcombine.low %v2383_v63, %v2390_v56  ;;  %v2407_v5 = vrot.slane %v2393_v52, %v5055_v59  ;;  %v4078_v59 = vld [vmem:[#allocation17 + $0x20] sm:$0xff]   ;;  %v4089_v61 = vld [vmem:[#allocation19 + $0x30] sm:$0xff]  }
 0x41d   : > { %v2422_v34 = vpack.c.bf16 %v2374_v53, %v2357_v24  ;;  %3804 = vmatpush3.bf16.msra.mxu0 %v4078_v59 }
 0x41e   : > { %v2408_v7 = vcombine.low %v2400_v45, %v2407_v5  ;;  %3805 = vmatprep.subr.bf16.mxu0 %v5772_v23  ;;  %v3499_v5 = vld [vmem:[%s5778_s11] ss:$0 sm:$0xff] }
 0x420   : > { %v2423_v0 = vpack.c.bf16 %v2408_v7, %v2391_v44 }
 0x421   : > { %3806 = vmatpush3.bf16.msra.mxu0 %v4080_v2 }
 0x422   : > { %3756 = vmatmul.mubr.bf16.gmra.mrb[32].mxu0 %v2421_v47  ;;  %3807 = vmatprep.subr.bf16.mxu0 %v5772_v23 }
 0x423   : > { %3759 = vmatprep.mubr.msk.bf16.mxu0 %vm4462_vm0, %v5772_v23 }
 0x425   : > { %3808 = vmatpush3.bf16.msra.mxu0 %v4081_v54 }
 0x426   : > { %3809 = vmatprep.subr.bf16.mxu0 %v5772_v23 }
 0x429   : > { %3810 = vmatpush3.bf16.msra.mxu0 %v4082_v31 }
 0x42a   : > { %3760 = vmatmul.mubr.bf16.gmra.mrb[36].mxu0 %v2422_v34 }
 0x42b   : > { %3763 = vmatprep.mubr.msk.bf16.mxu0 %vm4462_vm0, %v5772_v23 }
 0x432   : > { %3764 = vmatmul.mubr.bf16.gmra.mrb[40].mxu0 %v2423_v0 }
 0x433   : > { %3811 = vmatprep.mubr.msk.bf16.mxu0 %vm4462_vm0, %v5772_v23 }
 0x4da   : > { %v2529_v29 = vpop.f32.mrb[24].mxu0 }
 0x4db   : > { %v3749_v33 = vpop.f32.mrb[25].mxu0  ;;  %v2530_v25 = vadd.f32 %v3474_v62, %v2529_v29 }
 0x4dc   : > { %v2532_v48 = vpop.f32.mrb[26].mxu0 }
 0x4dd   : > { %v2533_v9 = vadd.f32 %v3474_v62, %v2532_v48  ;;  %v3750_v10 = vpop.f32.mrb[27].mxu0 }
 0x4df   : > { %v2568_v18 = vpack.c.bf16 %v2533_v9, %v2530_v25 }
 0x4e1   : > { %3784 = vmatmul.mubr.bf16.vlgmr.msra.gmra.mrb[32].mxu1 %v2568_v18 }
 0x4e2   : > { %3787 = vmatprep.mubr.msk.bf16.mxu1 %vm4462_vm0, %v5772_v23  ;;  %3824 = vmatpush3.bf16.msra.mxu1 %v4083_v32 }
 0x4e3   : > { %3825 = vmatprep.subr.bf16.mxu1 %v4084_v27 }
 0x4e6   : > { %3826 = vmatpush3.bf16.msra.mxu1 %v4084_v27 }
 0x4e7   : > { %3827 = vmatprep.subr.bf16.mxu1 %v4085_v3 }
 0x4ea   : > { %3828 = vmatpush3.bf16.msra.mxu1 %v4085_v3 }
 0x4eb   : > { %3829 = vmatprep.subr.bf16.mxu1 %v4086_v28 }
 0x4ed   : > { %v2537_v6 = vpop.f32.mrb[28].mxu0 }
 0x4ee   : > { %v3753_v40 = vpop.f32.mrb[29].mxu0  ;;  %v2538_v57 = vadd.f32 %v3474_v62, %v2537_v6  ;;  %3830 = vmatpush3.bf16.msra.mxu1 %v4086_v28 }
 0x4ef   : > { %v2540_v55 = vpop.f32.mrb[30].mxu0  ;;  %3831 = vmatprep.subr.bf16.mxu1 %v4087_v43 }
 0x4f0   : > { %v2541_v8 = vadd.f32 %v3474_v62, %v2540_v55  ;;  %v3754_v36 = vpop.f32.mrb[31].mxu0 }
 0x4f2   : > { %v2569_v41 = vpack.c.bf16 %v2541_v8, %v2538_v57  ;;  %3832 = vmatpush3.bf16.msra.mxu1 %v4087_v43 }
 0x4f4   : > { %3788 = vmatmul.mubr.bf16.gmra.mrb[36].mxu1 %v2569_v41 }
 0x4f5   : > { %v2545_v21 = vpop.f32.mrb[32].mxu0  ;;  %3791 = vmatprep.mubr.msk.bf16.mxu1 %vm4462_vm0, %v5772_v23 }
 0x4f6   : > { %v3757_v37 = vpop.f32.mrb[33].mxu0  ;;  %v2546_v4 = vadd.f32 %v3474_v62, %v2545_v21 }
 0x4f7   : > { %v2548_v38 = vpop.f32.mrb[34].mxu0 }
 0x4f8   : > { %v2549_v15 = vadd.f32 %v3474_v62, %v2548_v38  ;;  %v3758_v49 = vpop.f32.mrb[35].mxu0 }
 0x4fa   : > { %v2570_v30 = vpack.c.bf16 %v2549_v15, %v2546_v4 }
 0x4fc   : > { %3792 = vmatmul.mubr.bf16.gmra.mrb[40].mxu1 %v2570_v30  ;;  %3812 = vmatmul.mubr.bf16.vlgmr.msra.gmra.mrb[44].mxu0 %v2570_v30 }
 0x4fd   : > { %v2553_v50 = vpop.f32.mrb[36].mxu0  ;;  %3815 = vmatprep.mubr.msk.bf16.mxu0 %vm4462_vm0, %v5772_v23 }
 0x4fe   : > { %v3761_v42 = vpop.f32.mrb[37].mxu0  ;;  %v2554_v51 = vadd.f32 %v3474_v62, %v2553_v50 }
 0x4ff   : > { %v2556_v60 = vpop.f32.mrb[38].mxu0 }
 0x500   : > { %v2557_v22 = vadd.f32 %v3474_v62, %v2556_v60  ;;  %v3762_v14 = vpop.f32.mrb[39].mxu0 }
 0x502   : > { %v2571_v17 = vpack.c.bf16 %v2557_v22, %v2554_v51 }
 0x504   : > { %3816 = vmatmul.mubr.bf16.gmra.mrb[48].mxu0 %v2571_v17 }
 0x505   : > { %v2561_v46 = vpop.f32.mrb[40].mxu0  ;;  %3819 = vmatprep.mubr.msk.bf16.mxu0 %vm4462_vm0, %v5772_v23  ;;  %v4088_v23 = vld [vmem:[#allocation19 + $0x28] sm:$0xff]  }
 0x506   : > { %v3765_v11 = vpop.f32.mrb[41].mxu0  ;;  %v2562_v26 = vadd.f32 %v3474_v62, %v2561_v46  ;;  %3833 = vmatprep.subr.bf16.mxu1 %v4088_v23 }
 0x507   : > { %v2564_v1 = vpop.f32.mrb[42].mxu0  ;;  %3834 = vmatpush3.bf16.msra.mxu1 %v4088_v23 }
 0x508   : > { %v2565_v19 = vadd.f32 %v3474_v62, %v2564_v1  ;;  %v3766_v20 = vpop.f32.mrb[43].mxu0  ;;  %3835 = vmatprep.subr.bf16.mxu1 %v4089_v61 }
 0x50a   : > { %v2572_v12 = vpack.c.bf16 %v2565_v19, %v2562_v26  ;;  %v3500_v26 = vld [vmem:[%s5779_s24] ss:$0 sm:$0xff] }
 0x50b   : > { %3836 = vmatpush3.bf16.msra.mxu1 %v4089_v61 }
 0x50c   : > { %3820 = vmatmul.mubr.bf16.gmra.mrb[52].mxu0 %v2572_v12  ;;  %3837 = vmatprep.subr.bf16.mxu1 %v4090_v16 }
 0x50f   : > { %3838 = vmatpush3.bf16.msra.mxu1 %v4090_v16 }
 0x5b4   : > { %v2671_v63 = vpop.f32.mrb[32].mxu1 }
 0x5b5   : > { %v3785_v35 = vpop.f32.mrb[33].mxu1 }
 0x5b6   : > { %v2674_v39 = vpop.f32.mrb[34].mxu1 }
 0x5b7   : > { %v3786_v56 = vpop.f32.mrb[35].mxu1 }
 0x5c7   : > { %v2679_v52 = vpop.f32.mrb[36].mxu1 }
 0x5c8   : > { %v3789_v24 = vpop.f32.mrb[37].mxu1 }
 0x5c9   : > { %v2682_v45 = vpop.f32.mrb[38].mxu1 }
 0x5ca   : > { %v3790_v47 = vpop.f32.mrb[39].mxu1 }
 0x5cf   : > { %v2687_v53 = vpop.f32.mrb[40].mxu1  ;;  %v2792_v44 = vpop.f32.mrb[44].mxu0 }
 0x5d0   : > { %v2815_v34 = vadd.f32 %v2792_v44, %v2671_v63  ;;  %v2817_v7 = vadd.f32 %v2792_v44, %v2679_v52  ;;  %v3793_v0 = vpop.f32.mrb[41].mxu1  ;;  %v3813_v13 = vpop.f32.mrb[45].mxu0 }
 0x5d1   : > { %v2690_v59 = vpop.f32.mrb[42].mxu1  ;;  %v2795_v58 = vpop.f32.mrb[46].mxu0 }
 0x5d2   : > { %v2830_v2 = vadd.f32 %v3499_v5, %v2815_v34  ;;  %v2832_v54 = vadd.f32 %v3499_v5, %v2817_v7  ;;  %v2816_v31 = vadd.f32 %v2795_v58, %v2674_v39  ;;  %v2818_v32 = vadd.f32 %v2795_v58, %v2682_v45  ;;  %v3794_v62 = vpop.f32.mrb[43].mxu1  ;;  %v3814_v29 = vpop.f32.mrb[47].mxu0 }
 0x5d4   : > { %v2831_v33 = vadd.f32 %v3499_v5, %v2816_v31  ;;  %v2833_v48 = vadd.f32 %v3499_v5, %v2818_v32  ;;  %v2838_v25 = vmax.f32 %v2830_v2, 0.0  ;;  %v2840_v9 = vmax.f32 %v2832_v54, 0.0 }
 0x5d6   : > { %v2839_v10 = vmax.f32 %v2831_v33, 0.0  ;;  %v2841_v18 = vmax.f32 %v2833_v48, 0.0 }
 0x5d7   : > { %v2800_v6 = vpop.f32.mrb[48].mxu0 }
 0x5d8   : > { %v2847_v40 = vpack.c.bf16 %v2841_v18, %v2840_v9  ;;  %v2819_v55 = vadd.f32 %v2800_v6, %v2687_v53  ;;  %v3817_v57 = vpop.f32.mrb[49].mxu0  ;;  %v2846_v8 = vpack.c.bf16 %v2839_v10, %v2838_v25 }
 0x5d9   : > { %v2803_v36 = vpop.f32.mrb[50].mxu0 }
 0x5da   : > { %v2834_v41 = vadd.f32 %v3499_v5, %v2819_v55  ;;  %v2820_v21 = vadd.f32 %v2803_v36, %v2690_v59  ;;  %v3818_v37 = vpop.f32.mrb[51].mxu0  ;;  %3839 = vmatprep.mubr.bf16.mxu1 %v2846_v8 }
 0x5db   : > { %3840 = vmatmul.mubr.bf16.vlgmr.msra.gmra.mrb[44].mxu1 %v2847_v40 }
 0x5dc   : > { %v2835_v38 = vadd.f32 %v3499_v5, %v2820_v21  ;;  %v2842_v4 = vmax.f32 %v2834_v41, 0.0  ;;  %v3518_v41 = vld [vmem:[%s4923_s19] sm:$0xff]  }
 0x5dd   : > { %v3519_v37 = vunpack.c.l.bf16 %v3518_v41 }
 0x5de   : > { %v2843_v15 = vmax.f32 %v2835_v38, 0.0 }
 0x5df   : > { %v2808_v49 = vpop.f32.mrb[52].mxu0 }
 0x5e0   : > { %v2821_v30 = vadd.f32 %v2808_v49, %v2687_v53  ;;  %v3821_v50 = vpop.f32.mrb[53].mxu0  ;;  %v2848_v42 = vpack.c.bf16 %v2843_v15, %v2842_v4  ;;  %v3533_v4 = vld [vmem:[%s4923_s19 + $0x8] sm:$0xff]   ;;  %v3520_v15 = vunpack.c.h.bf16 %v3518_v41 }
 0x5e1   : > { %v2811_v60 = vpop.f32.mrb[54].mxu0  ;;  %v3523_v50 = vunpack.c.l.bf16 %v3533_v4 }
 0x5e2   : > { %v2836_v51 = vadd.f32 %v3499_v5, %v2821_v30  ;;  %v2822_v22 = vadd.f32 %v2811_v60, %v2690_v59  ;;  %v3822_v14 = vpop.f32.mrb[55].mxu0  ;;  %3843 = vmatprep.mubr.bf16.mxu1 %v2848_v42  ;;  %v3534_v42 = vld [vmem:[%s4923_s19 + $0x10] sm:$0xff]  }
 0x5e3   : > { %v3527_v14 = vunpack.c.l.bf16 %v3534_v42 }
 0x5e4   : > { %v2837_v17 = vadd.f32 %v3499_v5, %v2822_v22  ;;  %v2844_v46 = vmax.f32 %v2836_v51, 0.0  ;;  %v3524_v51 = vunpack.c.h.bf16 %v3533_v4 }
 0x5e6   : > { %v2845_v11 = vmax.f32 %v2837_v17, 0.0  ;;  %v3535_v17 = vld [vmem:[%s4923_s19 + $0x18] sm:$0xff]   ;;  %s846_s19 = scalar_select %p845_p5, %s4588_s0, 1 }
 0x5e8   : > { %v2849_v1 = vpack.c.bf16 %v2845_v11, %v2844_v46  ;;  %v3528_v11 = vunpack.c.h.bf16 %v3534_v42  ;;  %s847_s17 = scalar_lea.vmem %s5780_s14, %s846_s19 }
 0x5ea   : > { %3844 = vmatmul.mubr.bf16.gmra.mrb[48].mxu1 %v2849_v1 }
 0x6ae   : > { %v3841_v19 = vpop.f32.mrb[44].mxu1 }
 0x6af   : > { %v5559_v20 = vadd.f32 %v3841_v19, %v3500_v26  ;;  %v2955_v12 = vpop.f32.mrb[45].mxu1 }
 0x6b0   : > { %v5561_v27 = vadd.f32 %v3500_v26, %v2955_v12  ;;  %v3842_v3 = vpop.f32.mrb[46].mxu1  ;;  %v3532_v12 = vunpack.c.h.bf16 %v3535_v17 }
 0x6b1   : > { %2988 = vst [vmem:[%s5563_s6 + $0x10] sm:$0xff] %v5559_v20  ;;  %v5567_v28 = vadd.f32 %v3842_v3, %v3500_v26  ;;  %3014 = vmax.xlane.f32.xlu1 %v5559_v20  ;;  %v2958_v43 = vpop.f32.mrb[47].mxu1  ;;  %v3092_v22 = vmul.f32 %v3523_v50, %v5559_v20 }
 0x6b2   : > { %2986 = vst [vmem:[%s5563_s6] sm:$0xff] %v5561_v27  ;;  %v5572_v23 = vadd.f32 %v3500_v26, %v2958_v43  ;;  %3010 = vmax.xlane.f32.xlu0 %v5561_v27  ;;  %v3090_v30 = vmul.f32 %v3519_v37, %v5561_v27 }
 0x6b3   : > { %2989 = vst [vmem:[%s5563_s6 + $0x18] sm:$0xff] %v5567_v28  ;;  %v3093_v46 = vmul.f32 %v3524_v51, %v5567_v28 }
 0x6b4   : > { %2987 = vst [vmem:[%s5563_s6 + $0x8] sm:$0xff] %v5572_v23  ;;  %v3091_v60 = vmul.f32 %v3520_v15, %v5572_v23 }
 0x6b5   : > { %3016 = vmax.xlane.f32.xlu1 %v5567_v28 }
 0x6b6   : > { %3012 = vmax.xlane.f32.xlu0 %v5572_v23 }
 0x6bd   : > { %v3845_v61 = vpop.f32.mrb[48].mxu1 }
 0x6be   : > { %v5581_v16 = vadd.f32 %v3845_v61, %v3500_v26  ;;  %v2971_v63 = vpop.f32.mrb[49].mxu1 }
 0x6bf   : > { %v5583_v35 = vadd.f32 %v3500_v26, %v2971_v63  ;;  %v3846_v39 = vpop.f32.mrb[50].mxu1 }
 0x6c0   : > { %2992 = vst [vmem:[%s5563_s6 + $0x30] sm:$0xff] %v5581_v16  ;;  %v5587_v56 = vadd.f32 %v3846_v39, %v3500_v26  ;;  %v2974_v52 = vpop.f32.mrb[51].mxu1 }
 0x6c1   : > { %2990 = vst [vmem:[%s5563_s6 + $0x20] sm:$0xff] %v5583_v35  ;;  %v5591_v24 = vadd.f32 %v3500_v26, %v2974_v52  ;;  %3018 = vmax.xlane.f32.xlu0 %v5583_v35  ;;  %v3094_v1 = vmul.f32 %v3527_v14, %v5583_v35  ;;  %v3531_v26 = vunpack.c.l.bf16 %v3535_v17 }
 0x6c2   : > { %2993 = vst [vmem:[%s5563_s6 + $0x38] sm:$0xff] %v5587_v56 }
 0x6c3   : > { %2991 = vst [vmem:[%s5563_s6 + $0x28] sm:$0xff] %v5591_v24  ;;  %3020 = vmax.xlane.f32.xlu1 %v5591_v24  ;;  %v3095_v19 = vmul.f32 %v3528_v11, %v5591_v24 }
 0x6c5   : > { %3022 = vmax.xlane.f32.xlu0 %v5581_v16 }
 0x6c7   : > { %3024 = vmax.xlane.f32.xlu1 %v5587_v56 }
 0x73e   : > { %v5601_v45 = vpop.xlane.xlu1 %3014 }
 0x73f   : > { %v3028_v47 = vsub.f32 %v5559_v20, %v5601_v45  ;;  %v5605_v53 = vpop.xlane.xlu0 %3010  ;;  %v3097_v20 = vmul.f32 %v3532_v12, %v5587_v56 }
 0x740   : > { %v3026_v44 = vsub.f32 %v5561_v27, %v5605_v53  ;;  %v3096_v27 = vmul.f32 %v3531_v26, %v5581_v16 }
 0x741   : > { %v3038_v7 = vmul.f32 1.442695, %v3028_v47 }
 0x742   : > { %v3034_v5 = vmul.f32 1.442695, %v3026_v44  ;;  %v5609_v34 = vpop.xlane.xlu1 %3016 }
 0x743   : > { %v5611_v0 = vpop.xlane.xlu0 %3012  ;;  %v3029_v13 = vsub.f32 %v5567_v28, %v5609_v34 }
 0x744   : > { %4091 = vpow2.f32 %v3034_v5  ;;  %v3027_v59 = vsub.f32 %v5572_v23, %v5611_v0 }
 0x745   : > { %4093 = vpow2.f32 %v3038_v7  ;;  %v3040_v2 = vmul.f32 1.442695, %v3029_v13 }
 0x746   : > { %v3036_v58 = vmul.f32 1.442695, %v3027_v59 }
 0x748   : > { %4095 = vpow2.f32 %v3036_v58 }
 0x749   : > { %4097 = vpow2.f32 %v3040_v2 }
 0x74e   : > { %v4092_v54 = vpop.eup %4091  ;;  %v5617_v31 = vpop.xlane.xlu0 %3018 }
 0x74f   : > { %v3030_v32 = vsub.f32 %v5583_v35, %v5617_v31  ;;  %3050 = vadd.xlane.f32.xlu0 %v4092_v54  ;;  %v4094_v29 = vpop.eup %4093 }
 0x750   : > { %v5621_v62 = vpop.xlane.xlu1 %3020 }
 0x751   : > { %v3042_v33 = vmul.f32 1.442695, %v3030_v32  ;;  %v3031_v48 = vsub.f32 %v5591_v24, %v5621_v62 }
 0x752   : > { %v4096_v25 = vpop.eup %4095  ;;  %v5625_v9 = vpop.xlane.xlu0 %3022 }
 0x753   : > { %4099 = vpow2.f32 %v3042_v33  ;;  %v3044_v10 = vmul.f32 1.442695, %v3031_v48  ;;  %v3032_v18 = vsub.f32 %v5581_v16, %v5625_v9  ;;  %3052 = vadd.xlane.f32.xlu1 %v4096_v25  ;;  %3054 = vadd.xlane.f32.xlu0 %v4094_v29  ;;  %v4098_v57 = vpop.eup %4097 }
 0x754   : > { %v5629_v6 = vpop.xlane.xlu1 %3024 }
 0x755   : > { %4101 = vpow2.f32 %v3044_v10  ;;  %v3046_v40 = vmul.f32 1.442695, %v3032_v18  ;;  %v3033_v55 = vsub.f32 %v5587_v56, %v5629_v6 }
 0x757   : > { %4103 = vpow2.f32 %v3046_v40  ;;  %v3048_v8 = vmul.f32 1.442695, %v3033_v55  ;;  %3056 = vadd.xlane.f32.xlu1 %v4098_v57 }
 0x759   : > { %4105 = vpow2.f32 %v3048_v8 }
 0x75d   : > { %v4100_v36 = vpop.eup %4099 }
 0x75e   : > { %3058 = vadd.xlane.f32.xlu0 %v4100_v36 }
 0x75f   : > { %v4102_v21 = vpop.eup %4101 }
 0x760   : > { %3060 = vadd.xlane.f32.xlu1 %v4102_v21 }
 0x761   : > { %v4104_v38 = vpop.eup %4103 }
 0x762   : > { %3062 = vadd.xlane.f32.xlu0 %v4104_v38 }
 0x763   : > { %v4106_v49 = vpop.eup %4105 }
 0x764   : > { %3064 = vadd.xlane.f32.xlu1 %v4106_v49 }
 0x766   : > { %3098 = vadd.xlane.f32.xlu0 %v3090_v30 }
 0x768   : > { %3100 = vadd.xlane.f32.xlu1 %v3091_v60 }
 0x76a   : > { %3102 = vadd.xlane.f32.xlu0 %v3092_v22 }
 0x76c   : > { %3104 = vadd.xlane.f32.xlu1 %v3093_v46 }
 0x76e   : > { %3106 = vadd.xlane.f32.xlu0 %v3094_v1 }
 0x770   : > { %3108 = vadd.xlane.f32.xlu1 %v3095_v19 }
 0x772   : > { %3110 = vadd.xlane.f32.xlu0 %v3096_v27 }
 0x774   : > { %3112 = vadd.xlane.f32.xlu1 %v3097_v20 }
 0x7dc   : > { %v3051_v3 = vpop.xlane.xlu0 %3050 }
 0x7dd   : > { %4107 = vlog2.f32 %v3051_v3 }
 0x7e0   : > { %v3053_v43 = vpop.xlane.xlu1 %3052  ;;  %v3055_v28 = vpop.xlane.xlu0 %3054 }
 0x7e1   : > { %4109 = vlog2.f32 %v3053_v43 }
 0x7e2   : > { %4111 = vlog2.f32 %v3055_v28 }
 0x7e4   : > { %v3057_v23 = vpop.xlane.xlu1 %3056 }
 0x7e5   : > { %4113 = vlog2.f32 %v3057_v23 }
 0x7e7   : > { %v4108_v63 = vpop.eup %4107 }
 0x7e8   : > { %v3067_v24 = vmul.f32 0.6931472, %v4108_v63 }
 0x7ea   : > { %v3082_v59 = vadd.f32 %v3067_v24, %v5605_v53 }
 0x7eb   : > { %v3059_v61 = vpop.xlane.xlu0 %3058  ;;  %v4110_v35 = vpop.eup %4109 }
 0x7ec   : > { %4115 = vlog2.f32 %v3059_v61  ;;  %v4112_v52 = vpop.eup %4111  ;;  %v3069_v47 = vmul.f32 0.6931472, %v4110_v35 }
 0x7ed   : > { %v3061_v39 = vpop.xlane.xlu1 %3060  ;;  %v3071_v5 = vmul.f32 0.6931472, %v4112_v52 }
 0x7ee   : > { %4117 = vlog2.f32 %v3061_v39  ;;  %v3083_v58 = vadd.f32 %v3069_v47, %v5611_v0 }
 0x7ef   : > { %v3063_v16 = vpop.xlane.xlu0 %3062  ;;  %v4114_v56 = vpop.eup %4113  ;;  %v3084_v33 = vadd.f32 %v3071_v5, %v5601_v45 }
 0x7f0   : > { %4119 = vlog2.f32 %v3063_v16  ;;  %v3073_v13 = vmul.f32 0.6931472, %v4114_v56 }
 0x7f1   : > { %v3065_v44 = vpop.xlane.xlu1 %3064 }
 0x7f2   : > { %4121 = vlog2.f32 %v3065_v44  ;;  %v3085_v55 = vadd.f32 %v3073_v13, %v5609_v34 }
 0x7f3   : > { %v3099_v7 = vpop.xlane.xlu0 %3098 }
 0x7f4   : > { %v3114_v32 = vsub.f32 %v3082_v59, %v3099_v7 }
 0x7f5   : > { %v3101_v2 = vpop.xlane.xlu1 %3100 }
 0x7f6   : > { %v4116_v54 = vpop.eup %4115  ;;  %v3115_v29 = vsub.f32 %v3083_v58, %v3101_v2 }
 0x7f7   : > { %v3075_v48 = vmul.f32 0.6931472, %v4116_v54  ;;  %v3103_v25 = vpop.xlane.xlu0 %3102 }
 0x7f8   : > { %v4118_v10 = vpop.eup %4117  ;;  %v3122_v18 = vadd.f32 %v3115_v29, %v3114_v32  ;;  %v3116_v40 = vsub.f32 %v3084_v33, %v3103_v25 }
 0x7f9   : > { %v3077_v57 = vmul.f32 0.6931472, %v4118_v10  ;;  %v3105_v8 = vpop.xlane.xlu1 %3104  ;;  %v3086_v36 = vadd.f32 %v3075_v48, %v5617_v31 }
 0x7fa   : > { %v4120_v53 = vpop.eup %4119  ;;  %v3123_v41 = vadd.f32 %v3122_v18, %v3116_v40  ;;  %v3117_v0 = vsub.f32 %v3085_v55, %v3105_v8 }
 0x7fb   : > { %v3079_v21 = vmul.f32 0.6931472, %v4120_v53  ;;  %v3107_v37 = vpop.xlane.xlu0 %3106  ;;  %v3087_v38 = vadd.f32 %v3077_v57, %v5621_v62 }
 0x7fc   : > { %v4122_v4 = vpop.eup %4121  ;;  %v3124_v45 = vadd.f32 %v3123_v41, %v3117_v0  ;;  %v3118_v15 = vsub.f32 %v3086_v36, %v3107_v37 }
 0x7fd   : > { %v3081_v49 = vmul.f32 0.6931472, %v4122_v4  ;;  %v3109_v30 = vpop.xlane.xlu1 %3108  ;;  %v3088_v34 = vadd.f32 %v3079_v21, %v5625_v9 }
 0x7fe   : > { %v3125_v50 = vadd.f32 %v3124_v45, %v3118_v15  ;;  %v3119_v42 = vsub.f32 %v3087_v38, %v3109_v30 }
 0x7ff   : > { %v3111_v60 = vpop.xlane.xlu0 %3110  ;;  %v3089_v31 = vadd.f32 %v3081_v49, %v5629_v6 }
 0x800   : > { %v3126_v51 = vadd.f32 %v3125_v50, %v3119_v42  ;;  %v3120_v22 = vsub.f32 %v3088_v34, %v3111_v60 }
 0x801   : > { %v3113_v14 = vpop.xlane.xlu1 %3112 }
 0x802   : > { %v3127_v17 = vadd.f32 %v3126_v51, %v3120_v22  ;;  %v3121_v62 = vsub.f32 %v3089_v31, %v3113_v14 }
 0x804   : > { %v3128_v46 = vadd.f32 %v3127_v17, %v3121_v62 }
 0x806   : > { %v3129_v11 = vrot.slane %v3128_v46, 4 }
 0x808   : > { %v3130_v1 = vadd.f32 %v3129_v11, %v3128_v46 }
 0x80a   : > { %v3131_v26 = vrot.slane %v3130_v1, 2 }
 0x80c   : > { %v3132_v19 = vadd.f32 %v3131_v26, %v3130_v1 }
 0x80e   : > { %v3133_v12 = vrot.slane %v3132_v19, 1 }
 0x810   : > { %v3134_v9 = vadd.f32 %v3133_v12, %v3132_v19 }
 0x812   : > { %3136 = vst.msk [vmem:[%s847_s17] sm:$0x1] %vm3135_vm3, %v3134_v9 }
 0x813   : > { %s5781_s9 = sld [smem:[#allocation39_spill]]  ;;  %s3516_s16 = sshll.u32 %s4588_s0, 8 }
 0x814   : > { %s3170_s18 = sshll.u32 %s5563_s6, 4  ;;  %s5782_s26 = sld [smem:[#allocation51_spill]]  ;;  %s3171_s18 = int_to_ptr.vmem [resolvable:$true] %s3170_s18 }
 0x815   : > { %s4465_s27 = smov 256   ;;  %s4466_s22 = smov 512  }
 0x816   : > { %s4467_s21 = smov 2   ;;  %s4468_s23 = smov 128  }
 0x817   : > { %s4469_s0 = smov 8   ;;  %s4470_s24 = smov [#allocation25]  }
 0x818   : > { %s4471_s6 = smov 0  }
 0x819   : > { %p5783_p11 = scmp.ne.s32.totalorder %s5781_s9, 0 }
 0x81a   : > { %s3153_s11 = scalar_lea.hbm %s5782_s26, %s3516_s16 }
 0x81b   : > { %3903 = sst [smem:[#allocation26]] (%p5783_p11), %s4465_s27 }
 0x81c   : > { %3904 = sst [smem:[#allocation26 + $0x1]] (%p5783_p11), %s4466_s22 }
 0x81d   : > { %3905 = sst [smem:[#allocation26 + $0x2]] (%p5783_p11), %s4467_s21 }
 0x81e   : > { %3906 = sst [smem:[#allocation26 + $0x3]] (%p5783_p11), %s4468_s23 }
 0x81f   : > { %3907 = sst [smem:[#allocation26 + $0x4]] (%p5783_p11), %s4468_s23 }
 0x820   : > { %3908 = sst [smem:[#allocation26 + $0x5]] (%p5783_p11), %s4469_s0 }
 0x821   : > { %3909 = dma.general (%p5783_p11), %s3171_s18, 1024, %s3153_s11, %s3138_s1, %s4470_s24, [#allocation26], %s4471_s6, 0  }
 0x822 PF: > { %s5784_s19 = sld [smem:[#allocation36_spill]]  ;;  %s5785_s3 = sld [smem:[#allocation40_spill]] }
 0x828   : > { %s3201_s20 = sand.u32 1, %s5784_s19   ;;  %p5786_p12 = scmp.ne.s32.totalorder %s5785_s3, 0 }
 0x829   : > { %s3202_s14 = scalar_lea.sflag [#allocation4], %s3201_s20 }
 0x82a   : > { %p3937_p6 = pnand %p3407_p4, %p5786_p12 }
 0x82c   : > { %4416 = dma.done.wait (!%p3937_p6), %s3202_s14, 1024  }
 0x82d   : > { %4418 = vsyncadd (!%p3937_p6), %s3202_s14, 4294966272  ;;  %s5787_s30 = sld [smem:[#allocation37_spill]]  ;;  %s5788_s17 = sld [smem:[#allocation38_spill]] }
 0x82e   : > { %s5789_s27 = smov %s4425_s28  ;;  %s5790_s28 = smov %s4429_s29 }
 0x833   : > { %p39_p13 = scmp.ge.s32.totalorder %s5787_s30, 4   ;;  %s5791_s29 = smov %s5788_s17 }
 0x835   :  { %41 = sbr.rel (!%p39_p13) target bundleno = 24 (0x18), region = 216 }
 0x83c   :  { %3213 = vsyncpa [#allocation3], 1 }
 0x83d   :  { %3215 = vsyncpa [#allocation3 + $0x1], 1 }
 0x83e   :  { %3216 = vsyncpa [#allocation6], 1 }
 0x83f   :  { %3218 = vsyncpa [#allocation6 + $0x1], 1 }
 0x840   :  { %3219 = vsyncpa [#allocation9], 1 }
 0x841   :  { %3220 = vsyncpa [#allocation12], 1 }
 0x842   :  { %3221 = vsyncpa [#allocation15], 1 }
 0x843   :  { %3222 = vsyncpa [#allocation18], 1 }
 0x844   :  { %3223 = vsyncpa [#allocation4], 1 }
 0x845   :  { %3225 = vsyncpa [#allocation4 + $0x1], 1 }

</bundles_post_ra>
